<compile_context>
chip_gen: v5e
topology: v5e:2x2
jax: 0.10.0
libtpu: 0.0.40
codegen_flags: <defaults>
</compile_context>

<pallas_src>
import math
import functools

import jax
import jax.numpy as jnp
from jax.experimental import pallas as pl
from jax.experimental.pallas import tpu as pltpu  # noqa: F401  (kept for TPU-specific tuning hooks)


# ----------------------------- in-kernel math helpers -----------------------------

def _erf(x):
    # Abramowitz & Stegun 7.1.26 polynomial (max abs err ~1.5e-7).  Matches
    # torch's exact (erf-based) F.gelu to well within the test tolerance and
    # avoids relying on an erf lowering in Mosaic.  exp() goes to the EUP.
    a1, a2, a3, a4, a5 = 0.254829592, -0.284496736, 1.421413741, -1.453152027, 1.061405429
    p = 0.3275911
    s = jnp.where(x >= 0.0, 1.0, -1.0)
    ax = jnp.abs(x)
    t = 1.0 / (1.0 + p * ax)
    poly = ((((a5 * t + a4) * t + a3) * t + a2) * t + a1) * t
    return s * (1.0 - poly * jnp.exp(-ax * ax))


def _gelu_exact(x):
    return 0.5 * x * (1.0 + _erf(x * (1.0 / math.sqrt(2.0))))


def _layernorm(x, gamma, beta, eps):
    mu = jnp.mean(x, axis=-1, keepdims=True)
    xc = x - mu
    var = jnp.mean(xc * xc, axis=-1, keepdims=True)
    inv = jax.lax.rsqrt(var + eps)
    return xc * inv * gamma + beta


# ----------------------------------- kernel ---------------------------------------

def trans_block_kernel(x_ref,
                       ln1_g_ref, ln1_b_ref,
                       wqkv_ref, bqkv_ref,
                       wo_ref, bo_ref,
                       ln2_g_ref, ln2_b_ref,
                       w1_ref, b1_ref, w2_ref, b2_ref,
                       o_ref,
                       *, n_heads, head_size, eps):
    B, S, H = x_ref.shape
    BS = B * S

    # Flatten batch into the sublane/M dimension for all dense layers.
    x = x_ref[...].astype(jnp.float32).reshape(BS, H)
    resid1 = x

    # ---- attention_norm ----
    xn = _layernorm(x, ln1_g_ref[...], ln1_b_ref[...], eps)

    # ---- fused QKV projection: one (BS,H) x (H,3H) matmul ----
    qkv = jnp.dot(xn, wqkv_ref[...], preferred_element_type=jnp.float32) + bqkv_ref[...]
    # 128-lane-aligned slices.
    q = qkv[:, 0:H].reshape(B, S, H)
    k = qkv[:, H:2 * H].reshape(B, S, H)
    v = qkv[:, 2 * H:3 * H].reshape(B, S, H)

    wo = wo_ref[...]                      # load once; slice rows (sublane-aligned) per head
    scale = 1.0 / math.sqrt(head_size)

    # ---- multi-head attention; output projection folded into the head loop ----
    att = jnp.zeros((BS, H), jnp.float32)
    for h_i in range(n_heads):            # static loop, n_heads = 4
        lo = h_i * head_size
        hi = lo + head_size
        qh = q[:, :, lo:hi]               # (B, S, hd)
        kh = k[:, :, lo:hi]
        vh = v[:, :, lo:hi]

        s = jnp.einsum('bqd,bkd->bqk', qh, kh,
                       preferred_element_type=jnp.float32) * scale   # (B, S, S)
        m = jnp.max(s, axis=-1, keepdims=True)
        e = jnp.exp(s - m)
        denom = jnp.sum(e, axis=-1, keepdims=True)
        inv = pl.reciprocal(denom, approx=True)       # EUP
        inv = inv * (2.0 - denom * inv)               # one Newton step -> ~f32 exact
        probs = e * inv                               # softmax(dim=-1)

        ctx_h = jnp.einsum('bqk,bkd->bqd', probs, vh,
                           preferred_element_type=jnp.float32)        # (B, S, hd)
        # ctx @ Wo == sum_h ctx_h @ Wo[h*hd:(h+1)*hd, :]  (no concat, lane-dense acc)
        att = att + jnp.dot(ctx_h.reshape(BS, head_size), wo[lo:hi, :],
                            preferred_element_type=jnp.float32)

    att = att + bo_ref[...]
    x = att + resid1
    resid2 = x

    # ---- mlp_norm + mlp (GELU after fc1 AND fc2, per the spec) ----
    xn2 = _layernorm(x, ln2_g_ref[...], ln2_b_ref[...], eps)
    h1 = jnp.dot(xn2, w1_ref[...], preferred_element_type=jnp.float32) + b1_ref[...]
    h1 = _gelu_exact(h1)
    h2 = jnp.dot(h1, w2_ref[...], preferred_element_type=jnp.float32) + b2_ref[...]
    h2 = _gelu_exact(h2)

    y = h2 + resid2
    o_ref[...] = y.reshape(B, S, H).astype(o_ref.dtype)


# ---------------------------------- wrapper ----------------------------------------

def trans_block(x, params, *, n_heads, eps=1e-6):
    B, S, H = x.shape
    head_size = H // n_heads

    # Host-side QKV fusion: one (H, 3H) weight and one (1, 3H) bias.
    wqkv = jnp.concatenate([params["wq"], params["wk"], params["wv"]], axis=1)
    bqkv = jnp.concatenate([params["bq"], params["bk"], params["bv"]], axis=1)

    kernel = functools.partial(trans_block_kernel,
                               n_heads=n_heads, head_size=head_size, eps=eps)

    # Single invocation, no grid: the whole problem (~1 MB of f32 operands)
    # lives in VMEM; default full-array blocks are used for every operand.
    out = pl.pallas_call(
        kernel,
        out_shape=jax.ShapeDtypeStruct((B, S, H), x.dtype),
    )(x,
      params["ln1_g"], params["ln1_b"],
      wqkv, bqkv,
      params["wo"], params["bo"],
      params["ln2_g"], params["ln2_b"],
      params["w1"], params["b1"], params["w2"], params["b2"])

    weights = None  # Attention.vis is None => weights is None
    return out, weights


# ------------------------------ pure-JAX reference ---------------------------------

def trans_block_ref(x, params, *, n_heads, eps=1e-6):
    B, S, H = x.shape
    hd = H // n_heads

    def ln(z, g, b):
        mu = jnp.mean(z, -1, keepdims=True)
        var = jnp.mean((z - mu) ** 2, -1, keepdims=True)
        return (z - mu) * jax.lax.rsqrt(var + eps) * g + b

    h = x
    xn = ln(x, params["ln1_g"][0], params["ln1_b"][0])
    q = xn @ params["wq"] + params["bq"][0]
    k = xn @ params["wk"] + params["bk"][0]
    v = xn @ params["wv"] + params["bv"][0]
    q = q.reshape(B, S, n_heads, hd).transpose(0, 2, 1, 3)
    k = k.reshape(B, S, n_heads, hd).transpose(0, 2, 1, 3)
    v = v.reshape(B, S, n_heads, hd).transpose(0, 2, 1, 3)
    s = jnp.einsum("bhqd,bhkd->bhqk", q, k) / math.sqrt(hd)
    p = jax.nn.softmax(s, axis=-1)
    ctx = jnp.einsum("bhqk,bhkd->bhqd", p, v).transpose(0, 2, 1, 3).reshape(B, S, H)
    att = ctx @ params["wo"] + params["bo"][0]
    x = att + h
    h = x
    xn2 = ln(x, params["ln2_g"][0], params["ln2_b"][0])
    gelu = lambda z: jax.nn.gelu(z, approximate=False)
    y = gelu(gelu(xn2 @ params["w1"] + params["b1"][0]) @ params["w2"] + params["b2"][0])
    return y + h


# ------------------------------------- main -----------------------------------------

if __name__ == "__main__":
    # Small-but-consistent scaled-down TransBlock config:
    # hidden=128, heads=4 (head_size=32), mlp_dim=512, seq=8, batch=2.
    B, S, H, NH, M = 2, 8, 128, 4, 512
    key = jax.random.PRNGKey(0)
    ks = jax.random.split(key, 8)

    def w(k, shape, scale=0.02):
        return (scale * jax.random.normal(k, shape)).astype(jnp.float32)

    params = {
        "ln1_g": jnp.ones((1, H), jnp.float32),
        "ln1_b": jnp.zeros((1, H), jnp.float32),
        "wq": w(ks[0], (H, H)), "bq": jnp.zeros((1, H), jnp.float32),
        "wk": w(ks[1], (H, H)), "bk": jnp.zeros((1, H), jnp.float32),
        "wv": w(ks[2], (H, H)), "bv": jnp.zeros((1, H), jnp.float32),
        "wo": w(ks[3], (H, H)), "bo": jnp.zeros((1, H), jnp.float32),
        "ln2_g": jnp.ones((1, H), jnp.float32),
        "ln2_b": jnp.zeros((1, H), jnp.float32),
        "w1": w(ks[4], (H, M)), "b1": jnp.zeros((1, M), jnp.float32),
        "w2": w(ks[5], (M, H)), "b2": jnp.zeros((1, H), jnp.float32),
    }
    x = jax.random.normal(ks[6], (B, S, H), jnp.float32)

    out, weights = trans_block(x, params, n_heads=NH, eps=1e-6)
    out = jax.block_until_ready(out)

    ref = trans_block_ref(x, params, n_heads=NH, eps=1e-6)
    assert out.shape == (B, S, H)
    assert weights is None
    assert jnp.allclose(out, ref, rtol=1e-4, atol=1e-4), "mismatch vs reference"

    print("KERNEL_OK")
</pallas_src>

<mosaic_0001>
module attributes {stable_mosaic.version = 11 : i64} {
  func.func @trans_block_kernel(%arg0: memref<2x8x128xf32, #tpu.memory_space<vmem>>, %arg1: memref<1x128xf32, #tpu.memory_space<vmem>>, %arg2: memref<1x128xf32, #tpu.memory_space<vmem>>, %arg3: memref<128x384xf32, #tpu.memory_space<vmem>>, %arg4: memref<1x384xf32, #tpu.memory_space<vmem>>, %arg5: memref<128x128xf32, #tpu.memory_space<vmem>>, %arg6: memref<1x128xf32, #tpu.memory_space<vmem>>, %arg7: memref<1x128xf32, #tpu.memory_space<vmem>>, %arg8: memref<1x128xf32, #tpu.memory_space<vmem>>, %arg9: memref<128x512xf32, #tpu.memory_space<vmem>>, %arg10: memref<1x512xf32, #tpu.memory_space<vmem>>, %arg11: memref<512x128xf32, #tpu.memory_space<vmem>>, %arg12: memref<1x128xf32, #tpu.memory_space<vmem>>, %arg13: memref<2x8x128xf32, #tpu.memory_space<vmem>>) attributes {dimension_semantics = [], scalar_prefetch = 0 : i64, scratch_operands = 0 : i64, tpu.core_type = #tpu.core_type<tc>} {
    %c0 = arith.constant 0 : index
    %c0_0 = arith.constant 0 : index
    %c0_1 = arith.constant 0 : index
    %0 = vector.load %arg0[%c0, %c0_0, %c0_1] : memref<2x8x128xf32, #tpu.memory_space<vmem>>, vector<2x8x128xf32>
    %1 = vector.shape_cast %0 : vector<2x8x128xf32> to vector<16x128xf32>
    %c0_2 = arith.constant 0 : index
    %c0_3 = arith.constant 0 : index
    %2 = vector.load %arg1[%c0_2, %c0_3] : memref<1x128xf32, #tpu.memory_space<vmem>>, vector<1x128xf32>
    %c0_4 = arith.constant 0 : index
    %c0_5 = arith.constant 0 : index
    %3 = vector.load %arg2[%c0_4, %c0_5] : memref<1x128xf32, #tpu.memory_space<vmem>>, vector<1x128xf32>
    %cst = arith.constant dense<0.000000e+00> : vector<16xf32>
    %4 = vector.multi_reduction <add>, %1, %cst [1] : vector<16x128xf32> to vector<16xf32>
    %5 = vector.shape_cast %4 : vector<16xf32> to vector<16x1xf32>
    %cst_6 = arith.constant 1.280000e+02 : f32
    %6 = vector.broadcast %cst_6 : f32 to vector<16x1xf32>
    %7 = arith.divf %5, %6 : vector<16x1xf32>
    %8 = vector.broadcast %7 : vector<16x1xf32> to vector<16x128xf32>
    %9 = arith.subf %1, %8 : vector<16x128xf32>
    %10 = arith.mulf %9, %9 : vector<16x128xf32>
    %cst_7 = arith.constant dense<0.000000e+00> : vector<16xf32>
    %11 = vector.multi_reduction <add>, %10, %cst_7 [1] : vector<16x128xf32> to vector<16xf32>
    %12 = vector.shape_cast %11 : vector<16xf32> to vector<16x1xf32>
    %cst_8 = arith.constant 1.280000e+02 : f32
    %13 = vector.broadcast %cst_8 : f32 to vector<16x1xf32>
    %14 = arith.divf %12, %13 : vector<16x1xf32>
    %cst_9 = arith.constant 9.99999997E-7 : f32
    %15 = vector.broadcast %cst_9 : f32 to vector<16x1xf32>
    %16 = arith.addf %14, %15 : vector<16x1xf32>
    %17 = math.rsqrt %16 : vector<16x1xf32>
    %18 = vector.broadcast %17 : vector<16x1xf32> to vector<16x128xf32>
    %19 = arith.mulf %9, %18 : vector<16x128xf32>
    %20 = vector.broadcast %2 : vector<1x128xf32> to vector<16x128xf32>
    %21 = arith.mulf %19, %20 : vector<16x128xf32>
    %22 = vector.broadcast %3 : vector<1x128xf32> to vector<16x128xf32>
    %23 = arith.addf %21, %22 : vector<16x128xf32>
    %c0_10 = arith.constant 0 : index
    %c0_11 = arith.constant 0 : index
    %24 = vector.load %arg3[%c0_10, %c0_11] : memref<128x384xf32, #tpu.memory_space<vmem>>, vector<128x384xf32>
    %cst_12 = arith.constant dense<0.000000e+00> : vector<16x384xf32>
    %25 = tpu.matmul %23, %24, %cst_12 {dimension_numbers = #tpu.dot_dimension_numbers<[1], [0], [0], [1], [0, 0, 1, 1], [], []>} : vector<16x128xf32>, vector<128x384xf32>, vector<16x384xf32> -> vector<16x384xf32>
    %c0_13 = arith.constant 0 : index
    %c0_14 = arith.constant 0 : index
    %26 = vector.load %arg4[%c0_13, %c0_14] : memref<1x384xf32, #tpu.memory_space<vmem>>, vector<1x384xf32>
    %27 = vector.broadcast %26 : vector<1x384xf32> to vector<16x384xf32>
    %28 = arith.addf %25, %27 : vector<16x384xf32>
    %29 = vector.extract_strided_slice %28 {offsets = [0, 0], sizes = [16, 128], strides = [1, 1]} : vector<16x384xf32> to vector<16x128xf32>
    %30 = vector.shape_cast %29 : vector<16x128xf32> to vector<2x8x128xf32>
    %31 = vector.extract_strided_slice %28 {offsets = [0, 128], sizes = [16, 128], strides = [1, 1]} : vector<16x384xf32> to vector<16x128xf32>
    %32 = vector.shape_cast %31 : vector<16x128xf32> to vector<2x8x128xf32>
    %33 = vector.extract_strided_slice %28 {offsets = [0, 256], sizes = [16, 128], strides = [1, 1]} : vector<16x384xf32> to vector<16x128xf32>
    %34 = vector.shape_cast %33 : vector<16x128xf32> to vector<2x8x128xf32>
    %c0_15 = arith.constant 0 : index
    %c0_16 = arith.constant 0 : index
    %35 = vector.load %arg5[%c0_15, %c0_16] : memref<128x128xf32, #tpu.memory_space<vmem>>, vector<128x128xf32>
    %cst_17 = arith.constant 0.000000e+00 : f32
    %36 = vector.broadcast %cst_17 : f32 to vector<16x128xf32>
    %37 = vector.extract_strided_slice %30 {offsets = [0, 0, 0], sizes = [2, 8, 32], strides = [1, 1, 1]} : vector<2x8x128xf32> to vector<2x8x32xf32>
    %38 = vector.extract_strided_slice %32 {offsets = [0, 0, 0], sizes = [2, 8, 32], strides = [1, 1, 1]} : vector<2x8x128xf32> to vector<2x8x32xf32>
    %39 = vector.extract_strided_slice %34 {offsets = [0, 0, 0], sizes = [2, 8, 32], strides = [1, 1, 1]} : vector<2x8x128xf32> to vector<2x8x32xf32>
    "tpu.trace_start"() <{level = 10 : i32, message = "bqd,bkd->bqk"}> : () -> ()
    %cst_18 = arith.constant dense<0.000000e+00> : vector<2x8x8xf32>
    %40 = tpu.matmul %37, %38, %cst_18 {dimension_numbers = #tpu.dot_dimension_numbers<[2], [2], [1], [1], [0, 0, 0, 1, 1, 1], [0], [0]>} : vector<2x8x32xf32>, vector<2x8x32xf32>, vector<2x8x8xf32> -> vector<2x8x8xf32>
    "tpu.trace_stop"() : () -> ()
    %cst_19 = arith.constant 0.176776692 : f32
    %41 = vector.broadcast %cst_19 : f32 to vector<2x8x8xf32>
    %42 = arith.mulf %40, %41 : vector<2x8x8xf32>
    %cst_20 = arith.constant dense<0xFF800000> : vector<2x8xf32>
    %43 = vector.multi_reduction <maximumf>, %42, %cst_20 [2] : vector<2x8x8xf32> to vector<2x8xf32>
    %44 = vector.shape_cast %43 : vector<2x8xf32> to vector<2x8x1xf32>
    %45 = vector.broadcast %44 : vector<2x8x1xf32> to vector<2x8x8xf32>
    %46 = arith.subf %42, %45 : vector<2x8x8xf32>
    %47 = math.exp %46 : vector<2x8x8xf32>
    %cst_21 = arith.constant dense<0.000000e+00> : vector<2x8xf32>
    %48 = vector.multi_reduction <add>, %47, %cst_21 [2] : vector<2x8x8xf32> to vector<2x8xf32>
    %49 = vector.shape_cast %48 : vector<2x8xf32> to vector<2x8x1xf32>
    %50 = tpu.reciprocal %49 {approx = true} : vector<2x8x1xf32> -> vector<2x8x1xf32>
    %51 = arith.mulf %49, %50 : vector<2x8x1xf32>
    %cst_22 = arith.constant 2.000000e+00 : f32
    %52 = vector.broadcast %cst_22 : f32 to vector<2x8x1xf32>
    %53 = arith.subf %52, %51 : vector<2x8x1xf32>
    %54 = arith.mulf %50, %53 : vector<2x8x1xf32>
    %55 = vector.broadcast %54 : vector<2x8x1xf32> to vector<2x8x8xf32>
    %56 = arith.mulf %47, %55 : vector<2x8x8xf32>
    "tpu.trace_start"() <{level = 10 : i32, message = "bqk,bkd->bqd"}> : () -> ()
    %cst_23 = arith.constant dense<0.000000e+00> : vector<2x8x32xf32>
    %57 = tpu.matmul %56, %39, %cst_23 {dimension_numbers = #tpu.dot_dimension_numbers<[2], [1], [1], [2], [0, 0, 0, 1, 1, 2], [0], [0]>} : vector<2x8x8xf32>, vector<2x8x32xf32>, vector<2x8x32xf32> -> vector<2x8x32xf32>
    "tpu.trace_stop"() : () -> ()
    %58 = vector.shape_cast %57 : vector<2x8x32xf32> to vector<16x32xf32>
    %59 = vector.extract_strided_slice %35 {offsets = [0, 0], sizes = [32, 128], strides = [1, 1]} : vector<128x128xf32> to vector<32x128xf32>
    %cst_24 = arith.constant dense<0.000000e+00> : vector<16x128xf32>
    %60 = tpu.matmul %58, %59, %cst_24 {dimension_numbers = #tpu.dot_dimension_numbers<[1], [0], [0], [1], [0, 0, 1, 1], [], []>} : vector<16x32xf32>, vector<32x128xf32>, vector<16x128xf32> -> vector<16x128xf32>
    %61 = arith.addf %36, %60 : vector<16x128xf32>
    %62 = vector.extract_strided_slice %30 {offsets = [0, 0, 32], sizes = [2, 8, 32], strides = [1, 1, 1]} : vector<2x8x128xf32> to vector<2x8x32xf32>
    %63 = vector.extract_strided_slice %32 {offsets = [0, 0, 32], sizes = [2, 8, 32], strides = [1, 1, 1]} : vector<2x8x128xf32> to vector<2x8x32xf32>
    %64 = vector.extract_strided_slice %34 {offsets = [0, 0, 32], sizes = [2, 8, 32], strides = [1, 1, 1]} : vector<2x8x128xf32> to vector<2x8x32xf32>
    "tpu.trace_start"() <{level = 10 : i32, message = "bqd,bkd->bqk"}> : () -> ()
    %cst_25 = arith.constant dense<0.000000e+00> : vector<2x8x8xf32>
    %65 = tpu.matmul %62, %63, %cst_25 {dimension_numbers = #tpu.dot_dimension_numbers<[2], [2], [1], [1], [0, 0, 0, 1, 1, 1], [0], [0]>} : vector<2x8x32xf32>, vector<2x8x32xf32>, vector<2x8x8xf32> -> vector<2x8x8xf32>
    "tpu.trace_stop"() : () -> ()
    %cst_26 = arith.constant 0.176776692 : f32
    %66 = vector.broadcast %cst_26 : f32 to vector<2x8x8xf32>
    %67 = arith.mulf %65, %66 : vector<2x8x8xf32>
    %cst_27 = arith.constant dense<0xFF800000> : vector<2x8xf32>
    %68 = vector.multi_reduction <maximumf>, %67, %cst_27 [2] : vector<2x8x8xf32> to vector<2x8xf32>
    %69 = vector.shape_cast %68 : vector<2x8xf32> to vector<2x8x1xf32>
    %70 = vector.broadcast %69 : vector<2x8x1xf32> to vector<2x8x8xf32>
    %71 = arith.subf %67, %70 : vector<2x8x8xf32>
    %72 = math.exp %71 : vector<2x8x8xf32>
    %cst_28 = arith.constant dense<0.000000e+00> : vector<2x8xf32>
    %73 = vector.multi_reduction <add>, %72, %cst_28 [2] : vector<2x8x8xf32> to vector<2x8xf32>
    %74 = vector.shape_cast %73 : vector<2x8xf32> to vector<2x8x1xf32>
    %75 = tpu.reciprocal %74 {approx = true} : vector<2x8x1xf32> -> vector<2x8x1xf32>
    %76 = arith.mulf %74, %75 : vector<2x8x1xf32>
    %cst_29 = arith.constant 2.000000e+00 : f32
    %77 = vector.broadcast %cst_29 : f32 to vector<2x8x1xf32>
    %78 = arith.subf %77, %76 : vector<2x8x1xf32>
    %79 = arith.mulf %75, %78 : vector<2x8x1xf32>
    %80 = vector.broadcast %79 : vector<2x8x1xf32> to vector<2x8x8xf32>
    %81 = arith.mulf %72, %80 : vector<2x8x8xf32>
    "tpu.trace_start"() <{level = 10 : i32, message = "bqk,bkd->bqd"}> : () -> ()
    %cst_30 = arith.constant dense<0.000000e+00> : vector<2x8x32xf32>
    %82 = tpu.matmul %81, %64, %cst_30 {dimension_numbers = #tpu.dot_dimension_numbers<[2], [1], [1], [2], [0, 0, 0, 1, 1, 2], [0], [0]>} : vector<2x8x8xf32>, vector<2x8x32xf32>, vector<2x8x32xf32> -> vector<2x8x32xf32>
    "tpu.trace_stop"() : () -> ()
    %83 = vector.shape_cast %82 : vector<2x8x32xf32> to vector<16x32xf32>
    %84 = vector.extract_strided_slice %35 {offsets = [32, 0], sizes = [32, 128], strides = [1, 1]} : vector<128x128xf32> to vector<32x128xf32>
    %cst_31 = arith.constant dense<0.000000e+00> : vector<16x128xf32>
    %85 = tpu.matmul %83, %84, %cst_31 {dimension_numbers = #tpu.dot_dimension_numbers<[1], [0], [0], [1], [0, 0, 1, 1], [], []>} : vector<16x32xf32>, vector<32x128xf32>, vector<16x128xf32> -> vector<16x128xf32>
    %86 = arith.addf %61, %85 : vector<16x128xf32>
    %87 = vector.extract_strided_slice %30 {offsets = [0, 0, 64], sizes = [2, 8, 32], strides = [1, 1, 1]} : vector<2x8x128xf32> to vector<2x8x32xf32>
    %88 = vector.extract_strided_slice %32 {offsets = [0, 0, 64], sizes = [2, 8, 32], strides = [1, 1, 1]} : vector<2x8x128xf32> to vector<2x8x32xf32>
    %89 = vector.extract_strided_slice %34 {offsets = [0, 0, 64], sizes = [2, 8, 32], strides = [1, 1, 1]} : vector<2x8x128xf32> to vector<2x8x32xf32>
    "tpu.trace_start"() <{level = 10 : i32, message = "bqd,bkd->bqk"}> : () -> ()
    %cst_32 = arith.constant dense<0.000000e+00> : vector<2x8x8xf32>
    %90 = tpu.matmul %87, %88, %cst_32 {dimension_numbers = #tpu.dot_dimension_numbers<[2], [2], [1], [1], [0, 0, 0, 1, 1, 1], [0], [0]>} : vector<2x8x32xf32>, vector<2x8x32xf32>, vector<2x8x8xf32> -> vector<2x8x8xf32>
    "tpu.trace_stop"() : () -> ()
    %cst_33 = arith.constant 0.176776692 : f32
    %91 = vector.broadcast %cst_33 : f32 to vector<2x8x8xf32>
    %92 = arith.mulf %90, %91 : vector<2x8x8xf32>
    %cst_34 = arith.constant dense<0xFF800000> : vector<2x8xf32>
    %93 = vector.multi_reduction <maximumf>, %92, %cst_34 [2] : vector<2x8x8xf32> to vector<2x8xf32>
    %94 = vector.shape_cast %93 : vector<2x8xf32> to vector<2x8x1xf32>
    %95 = vector.broadcast %94 : vector<2x8x1xf32> to vector<2x8x8xf32>
    %96 = arith.subf %92, %95 : vector<2x8x8xf32>
    %97 = math.exp %96 : vector<2x8x8xf32>
    %cst_35 = arith.constant dense<0.000000e+00> : vector<2x8xf32>
    %98 = vector.multi_reduction <add>, %97, %cst_35 [2] : vector<2x8x8xf32> to vector<2x8xf32>
    %99 = vector.shape_cast %98 : vector<2x8xf32> to vector<2x8x1xf32>
    %100 = tpu.reciprocal %99 {approx = true} : vector<2x8x1xf32> -> vector<2x8x1xf32>
    %101 = arith.mulf %99, %100 : vector<2x8x1xf32>
    %cst_36 = arith.constant 2.000000e+00 : f32
    %102 = vector.broadcast %cst_36 : f32 to vector<2x8x1xf32>
    %103 = arith.subf %102, %101 : vector<2x8x1xf32>
    %104 = arith.mulf %100, %103 : vector<2x8x1xf32>
    %105 = vector.broadcast %104 : vector<2x8x1xf32> to vector<2x8x8xf32>
    %106 = arith.mulf %97, %105 : vector<2x8x8xf32>
    "tpu.trace_start"() <{level = 10 : i32, message = "bqk,bkd->bqd"}> : () -> ()
    %cst_37 = arith.constant dense<0.000000e+00> : vector<2x8x32xf32>
    %107 = tpu.matmul %106, %89, %cst_37 {dimension_numbers = #tpu.dot_dimension_numbers<[2], [1], [1], [2], [0, 0, 0, 1, 1, 2], [0], [0]>} : vector<2x8x8xf32>, vector<2x8x32xf32>, vector<2x8x32xf32> -> vector<2x8x32xf32>
    "tpu.trace_stop"() : () -> ()
    %108 = vector.shape_cast %107 : vector<2x8x32xf32> to vector<16x32xf32>
    %109 = vector.extract_strided_slice %35 {offsets = [64, 0], sizes = [32, 128], strides = [1, 1]} : vector<128x128xf32> to vector<32x128xf32>
    %cst_38 = arith.constant dense<0.000000e+00> : vector<16x128xf32>
    %110 = tpu.matmul %108, %109, %cst_38 {dimension_numbers = #tpu.dot_dimension_numbers<[1], [0], [0], [1], [0, 0, 1, 1], [], []>} : vector<16x32xf32>, vector<32x128xf32>, vector<16x128xf32> -> vector<16x128xf32>
    %111 = arith.addf %86, %110 : vector<16x128xf32>
    %112 = vector.extract_strided_slice %30 {offsets = [0, 0, 96], sizes = [2, 8, 32], strides = [1, 1, 1]} : vector<2x8x128xf32> to vector<2x8x32xf32>
    %113 = vector.extract_strided_slice %32 {offsets = [0, 0, 96], sizes = [2, 8, 32], strides = [1, 1, 1]} : vector<2x8x128xf32> to vector<2x8x32xf32>
    %114 = vector.extract_strided_slice %34 {offsets = [0, 0, 96], sizes = [2, 8, 32], strides = [1, 1, 1]} : vector<2x8x128xf32> to vector<2x8x32xf32>
    "tpu.trace_start"() <{level = 10 : i32, message = "bqd,bkd->bqk"}> : () -> ()
    %cst_39 = arith.constant dense<0.000000e+00> : vector<2x8x8xf32>
    %115 = tpu.matmul %112, %113, %cst_39 {dimension_numbers = #tpu.dot_dimension_numbers<[2], [2], [1], [1], [0, 0, 0, 1, 1, 1], [0], [0]>} : vector<2x8x32xf32>, vector<2x8x32xf32>, vector<2x8x8xf32> -> vector<2x8x8xf32>
    "tpu.trace_stop"() : () -> ()
    %cst_40 = arith.constant 0.176776692 : f32
    %116 = vector.broadcast %cst_40 : f32 to vector<2x8x8xf32>
    %117 = arith.mulf %115, %116 : vector<2x8x8xf32>
    %cst_41 = arith.constant dense<0xFF800000> : vector<2x8xf32>
    %118 = vector.multi_reduction <maximumf>, %117, %cst_41 [2] : vector<2x8x8xf32> to vector<2x8xf32>
    %119 = vector.shape_cast %118 : vector<2x8xf32> to vector<2x8x1xf32>
    %120 = vector.broadcast %119 : vector<2x8x1xf32> to vector<2x8x8xf32>
    %121 = arith.subf %117, %120 : vector<2x8x8xf32>
    %122 = math.exp %121 : vector<2x8x8xf32>
    %cst_42 = arith.constant dense<0.000000e+00> : vector<2x8xf32>
    %123 = vector.multi_reduction <add>, %122, %cst_42 [2] : vector<2x8x8xf32> to vector<2x8xf32>
    %124 = vector.shape_cast %123 : vector<2x8xf32> to vector<2x8x1xf32>
    %125 = tpu.reciprocal %124 {approx = true} : vector<2x8x1xf32> -> vector<2x8x1xf32>
    %126 = arith.mulf %124, %125 : vector<2x8x1xf32>
    %cst_43 = arith.constant 2.000000e+00 : f32
    %127 = vector.broadcast %cst_43 : f32 to vector<2x8x1xf32>
    %128 = arith.subf %127, %126 : vector<2x8x1xf32>
    %129 = arith.mulf %125, %128 : vector<2x8x1xf32>
    %130 = vector.broadcast %129 : vector<2x8x1xf32> to vector<2x8x8xf32>
    %131 = arith.mulf %122, %130 : vector<2x8x8xf32>
    "tpu.trace_start"() <{level = 10 : i32, message = "bqk,bkd->bqd"}> : () -> ()
    %cst_44 = arith.constant dense<0.000000e+00> : vector<2x8x32xf32>
    %132 = tpu.matmul %131, %114, %cst_44 {dimension_numbers = #tpu.dot_dimension_numbers<[2], [1], [1], [2], [0, 0, 0, 1, 1, 2], [0], [0]>} : vector<2x8x8xf32>, vector<2x8x32xf32>, vector<2x8x32xf32> -> vector<2x8x32xf32>
    "tpu.trace_stop"() : () -> ()
    %133 = vector.shape_cast %132 : vector<2x8x32xf32> to vector<16x32xf32>
    %134 = vector.extract_strided_slice %35 {offsets = [96, 0], sizes = [32, 128], strides = [1, 1]} : vector<128x128xf32> to vector<32x128xf32>
    %cst_45 = arith.constant dense<0.000000e+00> : vector<16x128xf32>
    %135 = tpu.matmul %133, %134, %cst_45 {dimension_numbers = #tpu.dot_dimension_numbers<[1], [0], [0], [1], [0, 0, 1, 1], [], []>} : vector<16x32xf32>, vector<32x128xf32>, vector<16x128xf32> -> vector<16x128xf32>
    %136 = arith.addf %111, %135 : vector<16x128xf32>
    %c0_46 = arith.constant 0 : index
    %c0_47 = arith.constant 0 : index
    %137 = vector.load %arg6[%c0_46, %c0_47] : memref<1x128xf32, #tpu.memory_space<vmem>>, vector<1x128xf32>
    %138 = vector.broadcast %137 : vector<1x128xf32> to vector<16x128xf32>
    %139 = arith.addf %136, %138 : vector<16x128xf32>
    %140 = arith.addf %139, %1 : vector<16x128xf32>
    %c0_48 = arith.constant 0 : index
    %c0_49 = arith.constant 0 : index
    %141 = vector.load %arg7[%c0_48, %c0_49] : memref<1x128xf32, #tpu.memory_space<vmem>>, vector<1x128xf32>
    %c0_50 = arith.constant 0 : index
    %c0_51 = arith.constant 0 : index
    %142 = vector.load %arg8[%c0_50, %c0_51] : memref<1x128xf32, #tpu.memory_space<vmem>>, vector<1x128xf32>
    %cst_52 = arith.constant dense<0.000000e+00> : vector<16xf32>
    %143 = vector.multi_reduction <add>, %140, %cst_52 [1] : vector<16x128xf32> to vector<16xf32>
    %144 = vector.shape_cast %143 : vector<16xf32> to vector<16x1xf32>
    %cst_53 = arith.constant 1.280000e+02 : f32
    %145 = vector.broadcast %cst_53 : f32 to vector<16x1xf32>
    %146 = arith.divf %144, %145 : vector<16x1xf32>
    %147 = vector.broadcast %146 : vector<16x1xf32> to vector<16x128xf32>
    %148 = arith.subf %140, %147 : vector<16x128xf32>
    %149 = arith.mulf %148, %148 : vector<16x128xf32>
    %cst_54 = arith.constant dense<0.000000e+00> : vector<16xf32>
    %150 = vector.multi_reduction <add>, %149, %cst_54 [1] : vector<16x128xf32> to vector<16xf32>
    %151 = vector.shape_cast %150 : vector<16xf32> to vector<16x1xf32>
    %cst_55 = arith.constant 1.280000e+02 : f32
    %152 = vector.broadcast %cst_55 : f32 to vector<16x1xf32>
    %153 = arith.divf %151, %152 : vector<16x1xf32>
    %cst_56 = arith.constant 9.99999997E-7 : f32
    %154 = vector.broadcast %cst_56 : f32 to vector<16x1xf32>
    %155 = arith.addf %153, %154 : vector<16x1xf32>
    %156 = math.rsqrt %155 : vector<16x1xf32>
    %157 = vector.broadcast %156 : vector<16x1xf32> to vector<16x128xf32>
    %158 = arith.mulf %148, %157 : vector<16x128xf32>
    %159 = vector.broadcast %141 : vector<1x128xf32> to vector<16x128xf32>
    %160 = arith.mulf %158, %159 : vector<16x128xf32>
    %161 = vector.broadcast %142 : vector<1x128xf32> to vector<16x128xf32>
    %162 = arith.addf %160, %161 : vector<16x128xf32>
    %c0_57 = arith.constant 0 : index
    %c0_58 = arith.constant 0 : index
    %163 = vector.load %arg9[%c0_57, %c0_58] : memref<128x512xf32, #tpu.memory_space<vmem>>, vector<128x512xf32>
    %cst_59 = arith.constant dense<0.000000e+00> : vector<16x512xf32>
    %164 = tpu.matmul %162, %163, %cst_59 {dimension_numbers = #tpu.dot_dimension_numbers<[1], [0], [0], [1], [0, 0, 1, 1], [], []>} : vector<16x128xf32>, vector<128x512xf32>, vector<16x512xf32> -> vector<16x512xf32>
    %c0_60 = arith.constant 0 : index
    %c0_61 = arith.constant 0 : index
    %165 = vector.load %arg10[%c0_60, %c0_61] : memref<1x512xf32, #tpu.memory_space<vmem>>, vector<1x512xf32>
    %166 = vector.broadcast %165 : vector<1x512xf32> to vector<16x512xf32>
    %167 = arith.addf %164, %166 : vector<16x512xf32>
    %cst_62 = arith.constant 5.000000e-01 : f32
    %168 = vector.broadcast %cst_62 : f32 to vector<16x512xf32>
    %169 = arith.mulf %168, %167 : vector<16x512xf32>
    %cst_63 = arith.constant 0.707106769 : f32
    %170 = vector.broadcast %cst_63 : f32 to vector<16x512xf32>
    %171 = arith.mulf %167, %170 : vector<16x512xf32>
    %cst_64 = arith.constant 0.000000e+00 : f32
    %172 = vector.broadcast %cst_64 : f32 to vector<16x512xf32>
    %173 = arith.cmpf oge, %171, %172 : vector<16x512xf32>
    %cst_65 = arith.constant 1.000000e+00 : f32
    %cst_66 = arith.constant -1.000000e+00 : f32
    %174 = vector.broadcast %cst_65 : f32 to vector<16x512xf32>
    %175 = vector.broadcast %cst_66 : f32 to vector<16x512xf32>
    %176 = arith.select %173, %174, %175 : vector<16x512xi1>, vector<16x512xf32>
    %177 = math.absf %171 : vector<16x512xf32>
    %cst_67 = arith.constant 0.327591091 : f32
    %178 = vector.broadcast %cst_67 : f32 to vector<16x512xf32>
    %179 = arith.mulf %178, %177 : vector<16x512xf32>
    %cst_68 = arith.constant 1.000000e+00 : f32
    %180 = vector.broadcast %cst_68 : f32 to vector<16x512xf32>
    %181 = arith.addf %180, %179 : vector<16x512xf32>
    %cst_69 = arith.constant 1.000000e+00 : f32
    %182 = vector.broadcast %cst_69 : f32 to vector<16x512xf32>
    %183 = arith.divf %182, %181 : vector<16x512xf32>
    %cst_70 = arith.constant 1.06140542 : f32
    %184 = vector.broadcast %cst_70 : f32 to vector<16x512xf32>
    %185 = arith.mulf %184, %183 : vector<16x512xf32>
    %cst_71 = arith.constant -1.45315206 : f32
    %186 = vector.broadcast %cst_71 : f32 to vector<16x512xf32>
    %187 = arith.addf %185, %186 : vector<16x512xf32>
    %188 = arith.mulf %187, %183 : vector<16x512xf32>
    %cst_72 = arith.constant 1.42141378 : f32
    %189 = vector.broadcast %cst_72 : f32 to vector<16x512xf32>
    %190 = arith.addf %188, %189 : vector<16x512xf32>
    %191 = arith.mulf %190, %183 : vector<16x512xf32>
    %cst_73 = arith.constant -0.284496725 : f32
    %192 = vector.broadcast %cst_73 : f32 to vector<16x512xf32>
    %193 = arith.addf %191, %192 : vector<16x512xf32>
    %194 = arith.mulf %193, %183 : vector<16x512xf32>
    %cst_74 = arith.constant 0.254829586 : f32
    %195 = vector.broadcast %cst_74 : f32 to vector<16x512xf32>
    %196 = arith.addf %194, %195 : vector<16x512xf32>
    %197 = arith.mulf %196, %183 : vector<16x512xf32>
    %cst_75 = arith.constant 0.000000e+00 : f32
    %198 = vector.broadcast %cst_75 : f32 to vector<16x512xf32>
    %199 = arith.subf %198, %177 : vector<16x512xf32>
    %200 = arith.mulf %199, %177 : vector<16x512xf32>
    %201 = math.exp %200 : vector<16x512xf32>
    %202 = arith.mulf %197, %201 : vector<16x512xf32>
    %cst_76 = arith.constant 1.000000e+00 : f32
    %203 = vector.broadcast %cst_76 : f32 to vector<16x512xf32>
    %204 = arith.subf %203, %202 : vector<16x512xf32>
    %205 = arith.mulf %176, %204 : vector<16x512xf32>
    %cst_77 = arith.constant 1.000000e+00 : f32
    %206 = vector.broadcast %cst_77 : f32 to vector<16x512xf32>
    %207 = arith.addf %206, %205 : vector<16x512xf32>
    %208 = arith.mulf %169, %207 : vector<16x512xf32>
    %c0_78 = arith.constant 0 : index
    %c0_79 = arith.constant 0 : index
    %209 = vector.load %arg11[%c0_78, %c0_79] : memref<512x128xf32, #tpu.memory_space<vmem>>, vector<512x128xf32>
    %cst_80 = arith.constant dense<0.000000e+00> : vector<16x128xf32>
    %210 = tpu.matmul %208, %209, %cst_80 {dimension_numbers = #tpu.dot_dimension_numbers<[1], [0], [0], [1], [0, 0, 1, 1], [], []>} : vector<16x512xf32>, vector<512x128xf32>, vector<16x128xf32> -> vector<16x128xf32>
    %c0_81 = arith.constant 0 : index
    %c0_82 = arith.constant 0 : index
    %211 = vector.load %arg12[%c0_81, %c0_82] : memref<1x128xf32, #tpu.memory_space<vmem>>, vector<1x128xf32>
    %212 = vector.broadcast %211 : vector<1x128xf32> to vector<16x128xf32>
    %213 = arith.addf %210, %212 : vector<16x128xf32>
    %cst_83 = arith.constant 5.000000e-01 : f32
    %214 = vector.broadcast %cst_83 : f32 to vector<16x128xf32>
    %215 = arith.mulf %214, %213 : vector<16x128xf32>
    %cst_84 = arith.constant 0.707106769 : f32
    %216 = vector.broadcast %cst_84 : f32 to vector<16x128xf32>
    %217 = arith.mulf %213, %216 : vector<16x128xf32>
    %cst_85 = arith.constant 0.000000e+00 : f32
    %218 = vector.broadcast %cst_85 : f32 to vector<16x128xf32>
    %219 = arith.cmpf oge, %217, %218 : vector<16x128xf32>
    %cst_86 = arith.constant 1.000000e+00 : f32
    %cst_87 = arith.constant -1.000000e+00 : f32
    %220 = vector.broadcast %cst_86 : f32 to vector<16x128xf32>
    %221 = vector.broadcast %cst_87 : f32 to vector<16x128xf32>
    %222 = arith.select %219, %220, %221 : vector<16x128xi1>, vector<16x128xf32>
    %223 = math.absf %217 : vector<16x128xf32>
    %cst_88 = arith.constant 0.327591091 : f32
    %224 = vector.broadcast %cst_88 : f32 to vector<16x128xf32>
    %225 = arith.mulf %224, %223 : vector<16x128xf32>
    %cst_89 = arith.constant 1.000000e+00 : f32
    %226 = vector.broadcast %cst_89 : f32 to vector<16x128xf32>
    %227 = arith.addf %226, %225 : vector<16x128xf32>
    %cst_90 = arith.constant 1.000000e+00 : f32
    %228 = vector.broadcast %cst_90 : f32 to vector<16x128xf32>
    %229 = arith.divf %228, %227 : vector<16x128xf32>
    %cst_91 = arith.constant 1.06140542 : f32
    %230 = vector.broadcast %cst_91 : f32 to vector<16x128xf32>
    %231 = arith.mulf %230, %229 : vector<16x128xf32>
    %cst_92 = arith.constant -1.45315206 : f32
    %232 = vector.broadcast %cst_92 : f32 to vector<16x128xf32>
    %233 = arith.addf %231, %232 : vector<16x128xf32>
    %234 = arith.mulf %233, %229 : vector<16x128xf32>
    %cst_93 = arith.constant 1.42141378 : f32
    %235 = vector.broadcast %cst_93 : f32 to vector<16x128xf32>
    %236 = arith.addf %234, %235 : vector<16x128xf32>
    %237 = arith.mulf %236, %229 : vector<16x128xf32>
    %cst_94 = arith.constant -0.284496725 : f32
    %238 = vector.broadcast %cst_94 : f32 to vector<16x128xf32>
    %239 = arith.addf %237, %238 : vector<16x128xf32>
    %240 = arith.mulf %239, %229 : vector<16x128xf32>
    %cst_95 = arith.constant 0.254829586 : f32
    %241 = vector.broadcast %cst_95 : f32 to vector<16x128xf32>
    %242 = arith.addf %240, %241 : vector<16x128xf32>
    %243 = arith.mulf %242, %229 : vector<16x128xf32>
    %cst_96 = arith.constant 0.000000e+00 : f32
    %244 = vector.broadcast %cst_96 : f32 to vector<16x128xf32>
    %245 = arith.subf %244, %223 : vector<16x128xf32>
    %246 = arith.mulf %245, %223 : vector<16x128xf32>
    %247 = math.exp %246 : vector<16x128xf32>
    %248 = arith.mulf %243, %247 : vector<16x128xf32>
    %cst_97 = arith.constant 1.000000e+00 : f32
    %249 = vector.broadcast %cst_97 : f32 to vector<16x128xf32>
    %250 = arith.subf %249, %248 : vector<16x128xf32>
    %251 = arith.mulf %222, %250 : vector<16x128xf32>
    %cst_98 = arith.constant 1.000000e+00 : f32
    %252 = vector.broadcast %cst_98 : f32 to vector<16x128xf32>
    %253 = arith.addf %252, %251 : vector<16x128xf32>
    %254 = arith.mulf %215, %253 : vector<16x128xf32>
    %255 = arith.addf %254, %140 : vector<16x128xf32>
    %256 = vector.shape_cast %255 : vector<16x128xf32> to vector<2x8x128xf32>
    %c0_99 = arith.constant 0 : index
    %c0_100 = arith.constant 0 : index
    %c0_101 = arith.constant 0 : index
    %257 = vector.load %arg13[%c0_99, %c0_100, %c0_101] : memref<2x8x128xf32, #tpu.memory_space<vmem>>, vector<2x8x128xf32>
    tpu.vector_store %arg13[%c0_99, %c0_100, %c0_101], %256 {strides = array<i32>} : memref<2x8x128xf32, #tpu.memory_space<vmem>>, vector<2x8x128xf32>,
    return
  }
}

</mosaic_0001>

<bundles_post_ra>
// kernel: tpu_custom_call.1
= control target key start
LH: loop header
LB: loop body
LE: loop exit
PB: predicated region body
PF: predicated region fallthrough
CT: control target
= control target key end

     0   :  { %18 = vsyncpa [#allocation3], 0  ;;  %s2992_s0 = inlined_call_operand.hbm [shape: f32[2,8,128], index: 0, kind: input, shape index: {}]   ;;  %s2993_s1 = inlined_call_operand.hbm [shape: f32[1,128], index: 1, kind: input, shape index: {}]   ;;  %s2994_s2 = inlined_call_operand.hbm [shape: f32[1,128], index: 2, kind: input, shape index: {}]   ;;  %s2995_s3 = inlined_call_operand.hbm [shape: f32[128,384], index: 3, kind: input, shape index: {}]   ;;  %s2996_s4 = inlined_call_operand.vmem [shape: f32[1,384], index: 4, kind: input, shape index: {}]   ;;  %s2997_s5 = inlined_call_operand.hbm [shape: f32[128,128], index: 5, kind: input, shape index: {}]   ;;  %s2998_s6 = inlined_call_operand.hbm [shape: f32[1,128], index: 6, kind: input, shape index: {}]   ;;  %s2999_s7 = inlined_call_operand.hbm [shape: f32[1,128], index: 7, kind: input, shape index: {}]   ;;  %s3000_s8 = inlined_call_operand.hbm [shape: f32[1,128], index: 8, kind: input, shape index: {}]   ;;  %s3001_s9 = inlined_call_operand.hbm [shape: f32[128,512], index: 9, kind: input, shape index: {}]   ;;  %s3002_s10 = inlined_call_operand.vmem [shape: f32[1,512], index: 10, kind: input, shape index: {}]   ;;  %s3003_s11 = inlined_call_operand.hbm [shape: f32[512,128], index: 11, kind: input, shape index: {}]   ;;  %s3004_s12 = inlined_call_operand.vmem [shape: f32[1,128], index: 12, kind: input, shape index: {}]   ;;  %s3005_s13 = inlined_call_operand.hbm [shape: f32[2,8,128], index: 13, kind: output, shape index: {}]  }
   0x1   :  { %19 = vsyncpa [#allocation6], 0 }
   0x2   :  { %20 = vsyncpa [#allocation9], 0 }
   0x3   :  { %21 = vsyncpa [#allocation12], 0 }
   0x4   :  { %22 = vsyncpa [#allocation15], 0 }
   0x5   :  { %23 = vsyncpa [#allocation18], 0  ;;  %s43_s27 = sshll.u32 %s2993_s1, 4  ;;  %s44_s27 = int_to_ptr.hbm [resolvable:$true] %s43_s27 }
   0x6   :  { %24 = vsyncpa [#allocation4], 0  ;;  %s2297_s28 = smov [#allocation5]   ;;  %s64_s15 = sshll.u32 %s2995_s3, 4  ;;  %s65_s15 = int_to_ptr.hbm [resolvable:$true] %s64_s15 }
   0x7   :  { %s45_s29 = sshll.u32 %s2297_s28, 4  ;;  %s2298_s16 = smov [#allocation8]   ;;  %s46_s29 = int_to_ptr.vmem [resolvable:$true] %s45_s29 }
   0x8   :  { %48 = dma.hbm_to_vmem [thread:$0]  %s44_s27, 16, %s46_s29, [#allocation6]  }
   0x9   :  { %s66_s17 = sshll.u32 %s2298_s16, 4  ;;  %s2299_s18 = smov 384   ;;  %s67_s17 = int_to_ptr.vmem [resolvable:$true] %s66_s17 }
   0xa   :  { %s2300_s19 = smov 24   ;;  %s93_s1 = sshll.u32 %s2998_s6, 4  ;;  %s94_s1 = int_to_ptr.hbm [resolvable:$true] %s93_s1 }
   0xb   :  { %72 = dma.hbm_to_vmem [thread:$0]  %s65_s15, 6144, %s67_s17, [#allocation9], %s2299_s18, %s2299_s18, %s2300_s19  }
   0xc   :  { %s2301_s22 = smov [#allocation11]   ;;  %s115_s3 = sshll.u32 %s3000_s8, 4  ;;  %s116_s3 = int_to_ptr.hbm [resolvable:$true] %s115_s3 }
   0xd   :  { %s95_s23 = sshll.u32 %s2301_s22, 4  ;;  %s2302_s26 = smov [#allocation14]   ;;  %s96_s23 = int_to_ptr.vmem [resolvable:$true] %s95_s23 }
   0xe   :  { %98 = dma.hbm_to_vmem [thread:$0]  %s94_s1, 16, %s96_s23, [#allocation12]  }
   0xf   :  { %s117_s27 = sshll.u32 %s2302_s26, 4  ;;  %s29_s30 = sshll.u32 %s2992_s0, 4  ;;  %s118_s27 = int_to_ptr.vmem [resolvable:$true] %s117_s27  ;;  %s30_s30 = int_to_ptr.hbm [resolvable:$true] %s29_s30 }
  0x10   :  { %120 = dma.hbm_to_vmem [thread:$0]  %s116_s3, 16, %s118_s27, [#allocation15]  }
  0x11   :  { %s2303_s6 = smov [#allocation2]   ;;  %s54_s17 = sshll.u32 %s2994_s2, 4  ;;  %s55_s17 = int_to_ptr.hbm [resolvable:$true] %s54_s17 }
  0x12   :  { %s31_s14 = sshll.u32 %s2303_s6, 4  ;;  %s2304_s18 = smov 128   ;;  %s32_s14 = int_to_ptr.vmem [resolvable:$true] %s31_s14 }
  0x13   :  { %s2305_s8 = smov 8   ;;  %s2306_s19 = smov [#allocation7]  }
  0x14   :  { %37 = dma.hbm_to_vmem [thread:$0]  %s30_s30, 256, %s32_s14, [#allocation3], %s2304_s18, %s2304_s18, %s2305_s8  }
  0x15   :  { %s56_s20 = sshll.u32 %s2306_s19, 4  ;;  %s79_s1 = sshll.u32 %s2997_s5, 4  ;;  %s57_s20 = int_to_ptr.vmem [resolvable:$true] %s56_s20  ;;  %s80_s1 = int_to_ptr.hbm [resolvable:$true] %s79_s1 }
  0x16   :  { %59 = dma.hbm_to_vmem [thread:$0]  %s55_s17, 16, %s57_s20, [#allocation6]  }
  0x17   :  { %s104_s2 = sshll.u32 %s2999_s7, 4  ;;  %s2307_s24 = smov [#allocation10]   ;;  %s105_s2 = int_to_ptr.hbm [resolvable:$true] %s104_s2 }
  0x18   :  { %s81_s25 = sshll.u32 %s2307_s24, 4  ;;  %s2308_s3 = smov [#allocation13]   ;;  %s82_s25 = int_to_ptr.vmem [resolvable:$true] %s81_s25 }
  0x19   :  { %87 = dma.hbm_to_vmem [thread:$0]  %s80_s1, 2048, %s82_s25, [#allocation9], %s2304_s18, %s2304_s18, %s2305_s8  }
  0x1a   :  { %s106_s26 = sshll.u32 %s2308_s3, 4  ;;  %s125_s5 = sshll.u32 %s3001_s9, 4  ;;  %s107_s26 = int_to_ptr.vmem [resolvable:$true] %s106_s26  ;;  %s126_s5 = int_to_ptr.hbm [resolvable:$true] %s125_s5 }
  0x1b   :  { %109 = dma.hbm_to_vmem [thread:$0]  %s105_s2, 16, %s107_s26, [#allocation12]  }
  0x1c   :  { %s2309_s29 = smov [#allocation16]   ;;  %s140_s14 = sshll.u32 %s3003_s11, 4  ;;  %s141_s14 = int_to_ptr.hbm [resolvable:$true] %s140_s14 }
  0x1d   :  { %s127_s30 = sshll.u32 %s2309_s29, 4  ;;  %s2310_s15 = smov 512   ;;  %s128_s30 = int_to_ptr.vmem [resolvable:$true] %s127_s30 }
  0x1e   :  { %s2311_s16 = smov 32   ;;  %s2312_s17 = smov [#allocation17]  }
  0x1f   :  { %133 = dma.hbm_to_vmem [thread:$0]  %s126_s5, 8192, %s128_s30, [#allocation15], %s2310_s15, %s2310_s15, %s2311_s16  }
  0x20   :  { %s142_s19 = sshll.u32 %s2312_s17, 4  ;;  %s143_s19 = int_to_ptr.vmem [resolvable:$true] %s142_s19 }
  0x21   :  { %148 = dma.hbm_to_vmem [thread:$0]  %s141_s14, 8192, %s143_s19, [#allocation18], %s2304_s18, %s2304_s18, %s2305_s8  }
  0x22   :  { %2283 = dma.done.wait [#allocation3], 256  }
  0x23   :  { %2284 = vsyncadd [#allocation3], 4294967040 }
  0x24   :  { %2285 = dma.done.wait [#allocation6], 32  }
  0x25   :  { %2286 = vsyncadd [#allocation6], 4294967264 }
  0x26   :  { %2287 = dma.done.wait [#allocation9], 8192  }
  0x27   :  { %2288 = vsyncadd [#allocation9], 4294959104 }
  0x28   :  { %2289 = dma.done.wait [#allocation12], 32  }
  0x29   :  { %2290 = vsyncadd [#allocation12], 4294967264 }
  0x2a   :  { %2291 = dma.done.wait [#allocation15], 8208  }
  0x2b   :  { %2292 = vsyncadd [#allocation15], 4294959088 }
  0x2c   :  { %2293 = dma.done.wait [#allocation18], 8192  }
  0x2d   :  { %2294 = vsyncadd [#allocation18], 4294959104  ;;  %v2428_v0 = vld [vmem:[#allocation2] sm:$0xff]  ;;  %v2431_v1 = vld [vmem:[#allocation2 + $0x8] sm:$0xff]  ;;  %v2313_v2 = vmov 128.0   ;;  %vm393_vm7 = vcmask 261120  }
  0x2e   :  { %195 = vadd.xlane.f32.xlu0 %v2428_v0  ;;  %1937 = vrcp.f32 %v2313_v2  ;;  %v297_v5 = vld [vmem:[#allocation8 + $0x168] sm:$0xff]  ;;  %v298_v6 = vld [vmem:[#allocation8 + $0x170] sm:$0xff]  ;;  %v299_v7 = vld [vmem:[#allocation8 + $0x178] sm:$0xff]  ;;  %vm448_vm8 = vcmask 64512   ;;  %s2315_s20 = smov 64   ;;  %s1855_s24 = sshll.u32 %s3005_s13, 4  ;;  %s1856_s24 = int_to_ptr.hbm [resolvable:$true] %s1855_s24 }
  0x2f   :  { %308 = vmatpush.msra.mxu0 %v297_v5  ;;  %331 = vmatpush.msra.mxu1 %v298_v6  ;;  %v294_v8 = vld [vmem:[#allocation8 + $0x150] sm:$0xff]  ;;  %v295_v9 = vld [vmem:[#allocation8 + $0x158] sm:$0xff]  ;;  %v296_v10 = vld [vmem:[#allocation8 + $0x160] sm:$0xff] }
  0x30   :  { %354 = vmatpush.msra.mxu2 %v299_v7  ;;  %v291_v23 = vld [vmem:[#allocation8 + $0x138] sm:$0xff]  ;;  %v292_v24 = vld [vmem:[#allocation8 + $0x140] sm:$0xff]  ;;  %v293_v25 = vld [vmem:[#allocation8 + $0x148] sm:$0xff] }
  0x31   :  { %309 = vmatpush.msra.mxu0 %v294_v8  ;;  %332 = vmatpush.msra.mxu1 %v295_v9  ;;  %v288_v26 = vld [vmem:[#allocation8 + $0x120] sm:$0xff]  ;;  %v289_v27 = vld [vmem:[#allocation8 + $0x128] sm:$0xff]  ;;  %v290_v28 = vld [vmem:[#allocation8 + $0x130] sm:$0xff] }
  0x32   :  { %355 = vmatpush.msra.mxu2 %v296_v10  ;;  %v285_v29 = vld [vmem:[#allocation8 + $0x108] sm:$0xff]  ;;  %v286_v30 = vld [vmem:[#allocation8 + $0x110] sm:$0xff]  ;;  %v287_v31 = vld [vmem:[#allocation8 + $0x118] sm:$0xff] }
  0x33   :  { %310 = vmatpush.msra.mxu0 %v291_v23  ;;  %333 = vmatpush.msra.mxu1 %v292_v24  ;;  %v282_v32 = vld [vmem:[#allocation8 + $0xf0] sm:$0xff]  ;;  %v283_v33 = vld [vmem:[#allocation8 + $0xf8] sm:$0xff]  ;;  %v284_v34 = vld [vmem:[#allocation8 + $0x100] sm:$0xff] }
  0x34   :  { %v1938_v3 = vpop.eup %1937  ;;  %356 = vmatpush.msra.mxu2 %v293_v25  ;;  %v279_v35 = vld [vmem:[#allocation8 + $0xd8] sm:$0xff]  ;;  %v280_v36 = vld [vmem:[#allocation8 + $0xe0] sm:$0xff]  ;;  %v281_v37 = vld [vmem:[#allocation8 + $0xe8] sm:$0xff] }
  0x35   :  { %v200_v4 = vmul.f32 128.0, %v1938_v3  ;;  %vm204_vm0 = vweird.f32 %v1938_v3  ;;  %311 = vmatpush.msra.mxu0 %v288_v26  ;;  %334 = vmatpush.msra.mxu1 %v289_v27  ;;  %v276_v38 = vld [vmem:[#allocation8 + $0xc0] sm:$0xff]  ;;  %v277_v39 = vld [vmem:[#allocation8 + $0xc8] sm:$0xff]  ;;  %v278_v40 = vld [vmem:[#allocation8 + $0xd0] sm:$0xff] }
  0x36   :  { %197 = vadd.xlane.f32.xlu0 %v2431_v1  ;;  %357 = vmatpush.msra.mxu2 %v290_v28  ;;  %v273_v41 = vld [vmem:[#allocation8 + $0xa8] sm:$0xff]  ;;  %v274_v42 = vld [vmem:[#allocation8 + $0xb0] sm:$0xff]  ;;  %v275_v43 = vld [vmem:[#allocation8 + $0xb8] sm:$0xff] }
  0x37   :  { %v201_v11 = vsub.f32 1.0, %v200_v4  ;;  %312 = vmatpush.msra.mxu0 %v285_v29  ;;  %335 = vmatpush.msra.mxu1 %v286_v30  ;;  %v270_v44 = vld [vmem:[#allocation8 + $0x90] sm:$0xff]  ;;  %v271_v45 = vld [vmem:[#allocation8 + $0x98] sm:$0xff]  ;;  %v272_v46 = vld [vmem:[#allocation8 + $0xa0] sm:$0xff] }
  0x38   :  { %358 = vmatpush.msra.mxu2 %v287_v31  ;;  %v267_v47 = vld [vmem:[#allocation8 + $0x78] sm:$0xff]  ;;  %v268_v48 = vld [vmem:[#allocation8 + $0x80] sm:$0xff]  ;;  %v269_v49 = vld [vmem:[#allocation8 + $0x88] sm:$0xff] }
  0x39   :  { %v202_v12 = vmul.f32 %v1938_v3, %v201_v11  ;;  %313 = vmatpush.msra.mxu0 %v282_v32  ;;  %336 = vmatpush.msra.mxu1 %v283_v33  ;;  %v264_v50 = vld [vmem:[#allocation8 + $0x60] sm:$0xff]  ;;  %v265_v51 = vld [vmem:[#allocation8 + $0x68] sm:$0xff]  ;;  %v266_v52 = vld [vmem:[#allocation8 + $0x70] sm:$0xff] }
  0x3a   :  { %359 = vmatpush.msra.mxu2 %v284_v34  ;;  %v261_v53 = vld [vmem:[#allocation8 + $0x48] sm:$0xff]  ;;  %v262_v54 = vld [vmem:[#allocation8 + $0x50] sm:$0xff]  ;;  %v263_v55 = vld [vmem:[#allocation8 + $0x58] sm:$0xff] }
  0x3b   :  { %v203_v13 = vadd.f32 %v1938_v3, %v202_v12  ;;  %314 = vmatpush.msra.mxu0 %v279_v35  ;;  %337 = vmatpush.msra.mxu1 %v280_v36  ;;  %v258_v56 = vld [vmem:[#allocation8 + $0x30] sm:$0xff]  ;;  %v259_v57 = vld [vmem:[#allocation8 + $0x38] sm:$0xff]  ;;  %v260_v58 = vld [vmem:[#allocation8 + $0x40] sm:$0xff] }
  0x3c   :  { %360 = vmatpush.msra.mxu2 %v281_v37  ;;  %v255_v59 = vld [vmem:[#allocation8 + $0x18] sm:$0xff]  ;;  %v256_v60 = vld [vmem:[#allocation8 + $0x20] sm:$0xff]  ;;  %v257_v61 = vld [vmem:[#allocation8 + $0x28] sm:$0xff] }
  0x3d   :  { %v2434_v14 = vsel %vm204_vm0, %v1938_v3, %v203_v13  ;;  %315 = vmatpush.msra.mxu0 %v276_v38  ;;  %338 = vmatpush.msra.mxu1 %v277_v39  ;;  %v252_v62 = vld [vmem:[#allocation8] sm:$0xff]  ;;  %v253_v63 = vld [vmem:[#allocation8 + $0x8] sm:$0xff]  ;;  %v254_v2 = vld [vmem:[#allocation8 + $0x10] sm:$0xff] }
  0x3e   :  { %361 = vmatpush.msra.mxu2 %v278_v40  ;;  %v1932_v24 = vld [vmem:[#allocation7] ss:$0 sm:$0xff] }
  0x3f   :  { %316 = vmatpush.msra.mxu0 %v273_v41  ;;  %339 = vmatpush.msra.mxu1 %v274_v42 }
  0x40   :  { %362 = vmatpush.msra.mxu2 %v275_v43 }
  0x41   :  { %317 = vmatpush.msra.mxu0 %v270_v44  ;;  %340 = vmatpush.msra.mxu1 %v271_v45 }
  0x42   :  { %363 = vmatpush.msra.mxu2 %v272_v46 }
  0x43   :  { %318 = vmatpush.msra.mxu0 %v267_v47  ;;  %341 = vmatpush.msra.mxu1 %v268_v48 }
  0x44   :  { %364 = vmatpush.msra.mxu2 %v269_v49 }
  0x45   :  { %319 = vmatpush.msra.mxu0 %v264_v50  ;;  %342 = vmatpush.msra.mxu1 %v265_v51 }
  0x46   :  { %365 = vmatpush.msra.mxu2 %v266_v52 }
  0x47   :  { %320 = vmatpush.msra.mxu0 %v261_v53  ;;  %343 = vmatpush.msra.mxu1 %v262_v54 }
  0x48   :  { %366 = vmatpush.msra.mxu2 %v263_v55 }
  0x49   :  { %321 = vmatpush.msra.mxu0 %v258_v56  ;;  %344 = vmatpush.msra.mxu1 %v259_v57 }
  0x4a   :  { %367 = vmatpush.msra.mxu2 %v260_v58 }
  0x4b   :  { %322 = vmatpush.msra.mxu0 %v255_v59  ;;  %345 = vmatpush.msra.mxu1 %v256_v60 }
  0x4c   :  { %368 = vmatpush.msra.mxu2 %v257_v61 }
  0x4d   :  { %323 = vmatpush.msra.mxu0 %v252_v62  ;;  %346 = vmatpush.msra.mxu1 %v253_v63 }
  0x4e   :  { %369 = vmatpush.msra.mxu2 %v254_v2 }
  0xa1   :  { %v196_v15 = vpop.xlane.xlu0 %195 }
  0xa2   :  { %v206_v16 = vmul.f32 %v2434_v14, %v196_v15 }
  0xa4   :  { %v2438_v17 = vsub.f32 %v2428_v0, %v206_v16 }
  0xa6   :  { %v210_v18 = vmul.f32 %v2438_v17, %v2438_v17 }
  0xa8   :  { %212 = vadd.xlane.f32.xlu1 %v210_v18 }
  0xa9   :  { %v198_v19 = vpop.xlane.xlu0 %197 }
  0xaa   :  { %v207_v20 = vmul.f32 %v2434_v14, %v198_v19  ;;  %v1931_v19 = vld [vmem:[#allocation5] ss:$0 sm:$0xff] }
  0xac   :  { %v2444_v21 = vsub.f32 %v2431_v1, %v207_v20 }
  0xae   :  { %v211_v22 = vmul.f32 %v2444_v21, %v2444_v21 }
  0xb0   :  { %214 = vadd.xlane.f32.xlu1 %v211_v22 }
 0x11b   :  { %v213_v3 = vpop.xlane.xlu1 %212 }
 0x11c   :  { %v216_v4 = vmul.f32 %v213_v3, %v2434_v14 }
 0x11e   :  { %v218_v5 = vadd.f32 1e-06, %v216_v4 }
 0x120   :  { %1939 = vrsqrt.f32 %v218_v5  ;;  %vm226_vm2 = vweird.f32 %v218_v5 }
 0x123   :  { %v215_v6 = vpop.xlane.xlu1 %214 }
 0x124   :  { %v217_v7 = vmul.f32 %v215_v6, %v2434_v14 }
 0x126   :  { %v1940_v8 = vpop.eup %1939  ;;  %v219_v9 = vadd.f32 1e-06, %v217_v7 }
 0x127   :  { %v221_v10 = vmul.f32 %v1940_v8, %v218_v5  ;;  %vm227_vm1 = vweird.f32 %v1940_v8 }
 0x128   :  { %1941 = vrsqrt.f32 %v219_v9  ;;  %vm228_vm3 = vmor %vm226_vm2, %vm227_vm1  ;;  %vm236_vm5 = vweird.f32 %v219_v9 }
 0x129   :  { %v222_v11 = vmul.f32 %v1940_v8, %v221_v10 }
 0x12b   :  { %v223_v12 = vmul.f32 0.5, %v222_v11 }
 0x12d   :  { %v224_v13 = vsub.f32 1.5, %v223_v12 }
 0x12e   :  { %v1942_v15 = vpop.eup %1941 }
 0x12f   :  { %v225_v16 = vmul.f32 %v1940_v8, %v224_v13  ;;  %v231_v18 = vmul.f32 %v1942_v15, %v219_v9  ;;  %vm237_vm4 = vweird.f32 %v1942_v15 }
 0x130   :  { %vm238_vm6 = vmor %vm236_vm5, %vm237_vm4 }
 0x131   :  { %v229_v20 = vsel %vm228_vm3, %v1940_v8, %v225_v16  ;;  %v232_v22 = vmul.f32 %v1942_v15, %v231_v18 }
 0x132   :  { %v240_v23 = vmul.f32 %v229_v20, %v2438_v17  ;;  %v300_v17 = vld [vmem:[%s2996_s4] sm:$0x7]  ;;  %s2314_s4 = smov 96  }
 0x133   :  { %v233_v25 = vmul.f32 0.5, %v232_v22  ;;  %v303_v34 = vperm.slane %v300_v17, 1  ;;  %v302_v35 = vperm.slane %v300_v17, 0  ;;  %v304_v39 = vperm.slane %v300_v17, 2 }
 0x134   :  { %v245_v26 = vmul.f32 %v1931_v19, %v240_v23 }
 0x135   :  { %v234_v27 = vsub.f32 1.5, %v233_v25 }
 0x136   :  { %v250_v28 = vadd.f32 %v1932_v24, %v245_v26  ;;  %v379_v26 = vld [vmem:[#allocation10 + $0x10] sm:$0xff] }
 0x137   :  { %v235_v29 = vmul.f32 %v1942_v15, %v234_v27  ;;  %v378_v27 = vld [vmem:[#allocation10 + $0x8] sm:$0xff] }
 0x138   :  { %324 = vmatmul.f32.vlgmr.msra.gmra.mxu0 %v250_v28  ;;  %347 = vmatmul.f32.vlgmr.msra.gmra.mxu1 %v250_v28 }
 0x139   :  { %v239_v30 = vsel %vm238_vm6, %v1942_v15, %v235_v29  ;;  %370 = vmatmul.f32.vlgmr.msra.gmra.mxu2 %v250_v28  ;;  %v377_v28 = vld [vmem:[#allocation10] sm:$0xff] }
 0x13a   :  { %v241_v31 = vmul.f32 %v239_v30, %v2444_v21 }
 0x13c   :  { %v246_v32 = vmul.f32 %v1931_v19, %v241_v31 }
 0x13e   :  { %v251_v33 = vadd.f32 %v1932_v24, %v246_v32  ;;  %v380_v24 = vld [vmem:[#allocation10 + $0x18] sm:$0xff] }
 0x140   :  { %327 = vmatmul.f32.gmra.mxu0 %v251_v33  ;;  %350 = vmatmul.f32.gmra.mxu1 %v251_v33 }
 0x141   :  { %373 = vmatmul.f32.gmra.mxu2 %v251_v33 }
 0x1b5   :  { %v325_v36 = vpop.f32.mrf.mxu0  ;;  %v348_v37 = vpop.f32.mrf.mxu1 }
 0x1b6   :  { %v2455_v38 = vadd.f32 %v348_v37, %v303_v34  ;;  %v2459_v21 = vadd.f32 %v325_v36, %v302_v35 }
 0x1b8   :  { %1873 = vmatpush.xpose.msk.msra.mxu3 %vm393_vm7, %v2455_v38 }
 0x1bb   :  { %1874 = vmatmul.msk.f32.vlgmr.msra.gmra.mxu3 %vm393_vm7, %v2459_v21 }
 0x1bc   :  { %v371_v40 = vpop.f32.mrf.mxu2 }
 0x1bd   :  { %v351_v41 = vpop.f32.mrf.mxu1  ;;  %v328_v42 = vpop.f32.mrf.mxu0  ;;  %v2465_v44 = vadd.f32 %v371_v40, %v304_v39 }
 0x1be   :  { %v2463_v43 = vadd.f32 %v351_v41, %v303_v34  ;;  %v2469_v45 = vadd.f32 %v328_v42, %v302_v35 }
 0x1c0   :  { %1875 = vmatpush.xpose.msk.msrb.mxu3 %vm393_vm7, %v2463_v43 }
 0x1c3   :  { %1876 = vmatmul.msk.f32.vlgmr.msrb.gmra.mxu3 %vm393_vm7, %v2469_v45 }
 0x1c4   :  { %495 = vmatpush.msra.mxu3 %v2465_v44  ;;  %v374_v46 = vpop.f32.mrf.mxu2 }
 0x1c5   :  { %v2474_v47 = vadd.f32 %v374_v46, %v304_v39 }
 0x1c7   :  { %518 = vmatpush.msrb.mxu3 %v2474_v47 }
 0x23e   :  { %v417_v48 = vpop.f32.mrf.mxu3 }
 0x23f   :  { %v446_v49 = vmul.f32 0.17677669, %v417_v48 }
 0x241   :  { %v449_v50 = vsel %vm448_vm8, %v446_v49, -inf }
 0x242   :  { %450 = vmax.xlane.f32.xlu2 %v449_v50 }
 0x246   :  { %v443_v51 = vpop.f32.mrf.mxu3 }
 0x247   :  { %v447_v52 = vmul.f32 0.17677669, %v443_v51 }
 0x249   :  { %v452_v53 = vsel %vm448_vm8, %v447_v52, -inf }
 0x24a   :  { %453 = vmax.xlane.f32.xlu2 %v452_v53 }
 0x262   :  { %525 = vrot.lane.b32.xlu2 %v2455_v38, %s2314_s4 }
 0x26a   :  { %551 = vrot.lane.b32.xlu2 %v2469_v45, %s2314_s4 }
 0x272   :  { %721 = vrot.lane.b32.xlu2 %v2459_v21, %s2315_s20 }
 0x27a   :  { %751 = vrot.lane.b32.xlu2 %v2463_v43, %s2315_s20 }
 0x282   :  { %807 = vrot.lane.b32.xlu2 %v2465_v44, %s2315_s20 }
 0x2b5   :  { %v451_v54 = vpop.xlane.xlu2 %450 }
 0x2b6   :  { %v455_v55 = vsub.f32 %v446_v49, %v451_v54 }
 0x2b8   :  { %v457_v56 = vmul.f32 1.442695, %v455_v55 }
 0x2ba   :  { %1943 = vpow2.f32 %v457_v56 }
 0x2bd   :  { %v454_v57 = vpop.xlane.xlu2 %453 }
 0x2be   :  { %v456_v58 = vsub.f32 %v447_v52, %v454_v57 }
 0x2c0   :  { %v1944_v59 = vpop.eup %1943  ;;  %v459_v60 = vmul.f32 1.442695, %v456_v58 }
 0x2c1   :  { %v461_v61 = vsel %vm448_vm8, %v1944_v59, 0.0 }
 0x2c2   :  { %1945 = vpow2.f32 %v459_v60  ;;  %462 = vadd.xlane.f32.xlu0 %v461_v61 }
 0x2c5   :  { %v526_v2 = vpop.permute.xlu2 %525 }
 0x2c8   :  { %v1946_v62 = vpop.eup %1945 }
 0x2c9   :  { %v464_v63 = vsel %vm448_vm8, %v1946_v62, 0.0 }
 0x2ca   :  { %465 = vadd.xlane.f32.xlu1 %v464_v63 }
 0x2cd   :  { %v552_v3 = vpop.permute.xlu2 %551 }
 0x2d5   :  { %v722_v6 = vpop.permute.xlu2 %721 }
 0x2d6   :  { %523 = vrot.lane.b32.xlu0 %v2459_v21, %s2314_s4 }
 0x2dd   :  { %v752_v15 = vpop.permute.xlu2 %751 }
 0x2de   :  { %723 = vrot.lane.b32.xlu0 %v2455_v38, %s2315_s20 }
 0x2e3   :  { %553 = vrot.lane.b32.xlu1 %v2463_v43, %s2314_s4 }
 0x2e5   :  { %v808_v23 = vpop.permute.xlu2 %807 }
 0x335   :  { %v463_v4 = vpop.xlane.xlu0 %462 }
 0x336   :  { %1947 = vrcp.f32 %v463_v4 }
 0x33c   :  { %v1948_v5 = vpop.eup %1947 }
 0x33d   :  { %v469_v7 = vmul.f32 %v1948_v5, %v463_v4  ;;  %v466_v8 = vpop.xlane.xlu1 %465 }
 0x33e   :  { %1949 = vrcp.f32 %v466_v8 }
 0x33f   :  { %v471_v9 = vsub.f32 2.0, %v469_v7 }
 0x341   :  { %v473_v10 = vmul.f32 %v1948_v5, %v471_v9 }
 0x343   :  { %v475_v11 = vmul.f32 %v1944_v59, %v473_v10 }
 0x344   :  { %v1950_v12 = vpop.eup %1949 }
 0x345   :  { %v470_v13 = vmul.f32 %v1950_v12, %v466_v8  ;;  %1877 = vmatmul.msk.f32.vlgmr.msra.gmra.mxu3 %vm448_vm8, %v475_v11 }
 0x346   :  { %1879 = vmatpush.xpose.msk.msra.mxu3 %vm393_vm7, %v526_v2 }
 0x347   :  { %v472_v16 = vsub.f32 2.0, %v470_v13 }
 0x348   :  { %v524_v18 = vpop.permute.xlu0 %523 }
 0x349   :  { %v474_v19 = vmul.f32 %v1950_v12, %v472_v16 }
 0x34b   :  { %v476_v20 = vmul.f32 %v1946_v62, %v474_v19 }
 0x34d   :  { %1878 = vmatmul.msk.f32.vlgmr.msrb.gmra.mxu3 %vm448_vm8, %v476_v20 }
 0x350   :  { %v724_v22 = vpop.permute.xlu0 %723 }
 0x351   :  { %1889 = vmatpush.xpose.msk.msrb.mxu0 %vm393_vm7, %v724_v22 }
 0x354   :  { %1890 = vmatmul.msk.f32.vlgmr.msrb.gmra.mxu0 %vm393_vm7, %v722_v6 }
 0x355   :  { %828 = vmatpush.msra.mxu0 %v808_v23  ;;  %v554_v25 = vpop.permute.xlu1 %553  ;;  %1880 = vmatmul.msk.f32.vlgmr.msra.gmra.mxu3 %vm393_vm7, %v524_v18 }
 0x356   :  { %1881 = vmatpush.xpose.msk.msrb.mxu3 %vm393_vm7, %v554_v25 }
 0x35a   :  { %710 = vmatpush.msra.mxu3 %v380_v24 }
 0x35c   :  { %711 = vmatpush.msra.mxu3 %v379_v26 }
 0x35d   :  { %1882 = vmatmul.msk.f32.vlgmr.msrb.gmra.mxu3 %vm393_vm7, %v552_v3 }
 0x35e   :  { %712 = vmatpush.msra.mxu3 %v378_v27 }
 0x360   :  { %713 = vmatpush.msra.mxu3 %v377_v28 }
 0x3c8   :  { %v497_v29 = vpop.f32.mrf.mxu3 }
 0x3c9   :  { %1887 = vmatmul.msk.f32.vlgmr.msra.gmra.mxu3 %vm393_vm7, %v497_v29 }
 0x3d0   :  { %v520_v30 = vpop.f32.mrf.mxu3 }
 0x3d1   :  { %1888 = vmatmul.msk.f32.gmra.mxu3 %vm393_vm7, %v520_v30  ;;  %v746_v31 = vpop.f32.mrf.mxu0 }
 0x3d2   :  { %v777_v32 = vmul.f32 0.17677669, %v746_v31 }
 0x3d4   :  { %v779_v33 = vsel %vm448_vm8, %v777_v32, -inf }
 0x3d5   :  { %780 = vmax.xlane.f32.xlu0 %v779_v33 }
 0x3d8   :  { %v548_v17 = vpop.f32.mrf.mxu3 }
 0x3d9   :  { %v579_v37 = vmul.f32 0.17677669, %v548_v17 }
 0x3db   :  { %v581_v39 = vsel %vm448_vm8, %v579_v37, -inf }
 0x3e0   :  { %v576_v34 = vpop.f32.mrf.mxu3 }
 0x3e1   :  { %v580_v35 = vmul.f32 0.17677669, %v576_v34 }
 0x3e3   :  { %v584_v36 = vsel %vm448_vm8, %v580_v35, -inf }
 0x3e4   :  { %585 = vmax.xlane.f32.xlu1 %v584_v36 }
 0x3e9   :  { %637 = vrot.lane.b32.xlu0 %v2474_v47, %s2314_s4 }
 0x3f1   :  { %749 = vrot.lane.b32.xlu0 %v2469_v45, %s2315_s20 }
 0x3f9   :  { %890 = vrot.lane.b32.xlu0 %v2459_v21, %s2311_s16 }
 0x423   :  { %582 = vmax.xlane.f32.xlu0 %v581_v39 }
 0x448   :  { %v781_v40 = vpop.xlane.xlu0 %780 }
 0x449   :  { %v785_v41 = vsub.f32 %v777_v32, %v781_v40 }
 0x44b   :  { %v787_v42 = vmul.f32 1.442695, %v785_v41 }
 0x44c   :  { %v2532_v6 = vpop.f32.mrf.mxu3 }
 0x44d   :  { %1951 = vpow2.f32 %v787_v42 }
 0x453   :  { %v1952_v46 = vpop.eup %1951 }
 0x454   :  { %v791_v48 = vsel %vm448_vm8, %v1952_v46, 0.0  ;;  %v2534_v7 = vpop.f32.mrf.mxu3 }
 0x455   :  { %792 = vadd.xlane.f32.xlu1 %v791_v48 }
 0x457   :  { %v586_v49 = vpop.xlane.xlu1 %585 }
 0x458   :  { %v588_v50 = vsub.f32 %v580_v35, %v586_v49 }
 0x45a   :  { %v591_v51 = vmul.f32 1.442695, %v588_v50 }
 0x45b   :  { %v638_v52 = vpop.permute.xlu0 %637 }
 0x45c   :  { %1953 = vpow2.f32 %v591_v51  ;;  %658 = vmatpush.msrb.mxu1 %v638_v52 }
 0x45e   :  { %1891 = vmatpush.xpose.msk.msra.mxu1 %vm393_vm7, %v752_v15 }
 0x462   :  { %v1954_v21 = vpop.eup %1953 }
 0x463   :  { %v596_v53 = vsel %vm448_vm8, %v1954_v21, 0.0  ;;  %v750_v61 = vpop.permute.xlu0 %749 }
 0x464   :  { %597 = vadd.xlane.f32.xlu2 %v596_v53  ;;  %v384_v53 = vld [vmem:[#allocation10 + $0x38] sm:$0xff] }
 0x46e   :  { %892 = vrot.lane.b32.xlu1 %v2455_v38, %s2311_s16 }
 0x476   :  { %920 = vrot.lane.b32.xlu1 %v2463_v43, %s2311_s16  ;;  %v891_v43 = vpop.permute.xlu0 %890 }
 0x47c   :  { %918 = vrot.lane.b32.xlu2 %v2469_v45, %s2311_s16 }
 0x496   :  { %v583_v9 = vpop.xlane.xlu0 %582 }
 0x497   :  { %v587_v11 = vsub.f32 %v579_v37, %v583_v9 }
 0x499   :  { %v589_v16 = vmul.f32 1.442695, %v587_v11 }
 0x4c8   :  { %v793_v54 = vpop.xlane.xlu1 %792 }
 0x4c9   :  { %1955 = vrcp.f32 %v793_v54 }
 0x4cf   :  { %v1956_v55 = vpop.eup %1955 }
 0x4d0   :  { %v799_v56 = vmul.f32 %v1956_v55, %v793_v54  ;;  %v383_v54 = vld [vmem:[#allocation10 + $0x30] sm:$0xff] }
 0x4d2   :  { %v801_v57 = vsub.f32 2.0, %v799_v56  ;;  %v381_v56 = vld [vmem:[#allocation10 + $0x20] sm:$0xff] }
 0x4d4   :  { %v803_v58 = vmul.f32 %v1956_v55, %v801_v57  ;;  %v382_v55 = vld [vmem:[#allocation10 + $0x28] sm:$0xff] }
 0x4d6   :  { %v805_v59 = vmul.f32 %v1952_v46, %v803_v58 }
 0x4d7   :  { %v598_v60 = vpop.xlane.xlu2 %597 }
 0x4d8   :  { %1957 = vrcp.f32 %v598_v60  ;;  %1893 = vmatmul.msk.f32.vlgmr.msra.gmra.mxu0 %vm448_vm8, %v805_v59  ;;  %v388_v59 = vld [vmem:[#allocation10 + $0x58] sm:$0xff] }
 0x4d9   :  { %1959 = vpow2.f32 %v589_v16 }
 0x4de   :  { %v1958_v62 = vpop.eup %1957 }
 0x4df   :  { %v602_v38 = vmul.f32 %v1958_v62, %v598_v60  ;;  %v919_v5 = vpop.permute.xlu2 %918  ;;  %v1960_v25 = vpop.eup %1959  ;;  %v387_v60 = vld [vmem:[#allocation10 + $0x50] sm:$0xff] }
 0x4e0   :  { %v893_v63 = vpop.permute.xlu1 %892  ;;  %v593_v26 = vsel %vm448_vm8, %v1960_v25, 0.0 }
 0x4e1   :  { %v604_v2 = vsub.f32 2.0, %v602_v38  ;;  %1897 = vmatpush.xpose.msk.msrb.mxu3 %vm393_vm7, %v893_v63 }
 0x4e3   :  { %v606_v45 = vmul.f32 %v1958_v62, %v604_v2 }
 0x4e4   :  { %1898 = vmatmul.msk.f32.vlgmr.msrb.gmra.mxu3 %vm393_vm7, %v891_v43 }
 0x4e5   :  { %v608_v3 = vmul.f32 %v1954_v21, %v606_v45  ;;  %v1926_v21 = vpack.i.bf16 %v2474_v47, %v2465_v44 }
 0x4e7   :  { %1884 = vmatmul.msk.f32.vlgmr.msrb.gmra.mxu1 %vm448_vm8, %v608_v3 }
 0x4e8   :  { %v921_v4 = vpop.permute.xlu1 %920 }
 0x4e9   :  { %1899 = vmatpush.xpose.msk.msrb.mxu0 %vm393_vm7, %v921_v4 }
 0x4ec   :  { %1900 = vmatmul.msk.f32.vlgmr.msrb.gmra.mxu0 %vm393_vm7, %v919_v5 }
 0x4ef   :  { %1892 = vmatmul.msk.f32.vlgmr.msra.gmra.mxu1 %vm393_vm7, %v750_v61 }
 0x555   :  { %v2536_v8 = vpop.f32.mrf.mxu0 }
 0x564   :  { %v2538_v10 = vpop.f32.mrf.mxu1 }
 0x567   :  { %v915_v12 = vpop.f32.mrf.mxu3 }
 0x568   :  { %v946_v13 = vmul.f32 0.17677669, %v915_v12 }
 0x569   :  { %v943_v15 = vpop.f32.mrf.mxu0 }
 0x56a   :  { %v947_v18 = vmul.f32 0.17677669, %v943_v15  ;;  %v948_v19 = vsel %vm448_vm8, %v946_v13, -inf }
 0x56b   :  { %949 = vmax.xlane.f32.xlu2 %v948_v19 }
 0x56c   :  { %v774_v20 = vpop.f32.mrf.mxu1  ;;  %v951_v22 = vsel %vm448_vm8, %v947_v18, -inf }
 0x56d   :  { %v778_v23 = vmul.f32 0.17677669, %v774_v20  ;;  %952 = vmax.xlane.f32.xlu0 %v951_v22 }
 0x56f   :  { %v782_v24 = vsel %vm448_vm8, %v778_v23, -inf }
 0x570   :  { %783 = vmax.xlane.f32.xlu1 %v782_v24  ;;  %v392_v24 = vld [vmem:[#allocation10 + $0x78] sm:$0xff] }
 0x571   :  { %1046 = vmatpush.msra.mxu0 %v392_v24  ;;  %v1154_v24 = vld [vmem:[#allocation16 + $0x118] sm:$0xff] }
 0x578   :  { %594 = vadd.xlane.f32.xlu1 %v593_v26  ;;  %v390_v26 = vld [vmem:[#allocation10 + $0x68] sm:$0xff] }
 0x583   :  { %610 = vrot.lane.b32.xlu2 %v2465_v44, %s2314_s4  ;;  %v386_v44 = vld [vmem:[#allocation10 + $0x48] sm:$0xff] }
 0x5de   :  { %v950_v27 = vpop.xlane.xlu2 %949 }
 0x5df   :  { %v954_v28 = vsub.f32 %v946_v13, %v950_v27  ;;  %v389_v27 = vld [vmem:[#allocation10 + $0x60] sm:$0xff] }
 0x5e0   :  { %v953_v29 = vpop.xlane.xlu0 %952 }
 0x5e1   :  { %v956_v30 = vmul.f32 1.442695, %v954_v28  ;;  %v955_v31 = vsub.f32 %v947_v18, %v953_v29 }
 0x5e3   :  { %1961 = vpow2.f32 %v956_v30  ;;  %v958_v32 = vmul.f32 1.442695, %v955_v31  ;;  %v784_v33 = vpop.xlane.xlu1 %783 }
 0x5e4   :  { %v786_v17 = vsub.f32 %v778_v23, %v784_v33 }
 0x5e5   :  { %1963 = vpow2.f32 %v958_v32 }
 0x5e6   :  { %v611_v34 = vpop.permute.xlu2 %610  ;;  %v789_v35 = vmul.f32 1.442695, %v786_v17  ;;  %v1933_v17 = vld [vmem:[#allocation11] ss:$0 sm:$0xff] }
 0x5e7   :  { %631 = vmatpush.msrb.mxu2 %v611_v34 }
 0x5e8   :  { %1965 = vpow2.f32 %v789_v35 }
 0x5e9   :  { %v2546_v36 = vpop.eup %1961  ;;  %681 = vmatpush.msra.mxu2 %v384_v53  ;;  %v1178_v53 = vld [vmem:[#allocation16 + $0x1d8] sm:$0xff] }
 0x5ea   :  { %v960_v37 = vsel %vm448_vm8, %v2546_v36, 0.0 }
 0x5eb   :  { %v1964_v39 = vpop.eup %1963  ;;  %961 = vadd.xlane.f32.xlu1 %v960_v37  ;;  %v595_v40 = vpop.xlane.xlu1 %594  ;;  %682 = vmatpush.msra.mxu2 %v383_v54 }
 0x5ec   :  { %1967 = vrcp.f32 %v595_v40  ;;  %v963_v41 = vsel %vm448_vm8, %v1964_v39, 0.0 }
 0x5ed   :  { %964 = vadd.xlane.f32.xlu0 %v963_v41  ;;  %683 = vmatpush.msra.mxu2 %v382_v55 }
 0x5ee   :  { %v1966_v42 = vpop.eup %1965 }
 0x5ef   :  { %v794_v49 = vsel %vm448_vm8, %v1966_v42, 0.0  ;;  %684 = vmatpush.msra.mxu2 %v381_v56 }
 0x5f2   :  { %v1968_v46 = vpop.eup %1967 }
 0x5f3   :  { %v601_v48 = vmul.f32 %v1968_v46, %v595_v40 }
 0x5f5   :  { %v603_v50 = vsub.f32 2.0, %v601_v48  ;;  %795 = vadd.xlane.f32.xlu0 %v794_v49 }
 0x5f7   :  { %v605_v51 = vmul.f32 %v1968_v46, %v603_v50  ;;  %v1180_v50 = vld [vmem:[#allocation16 + $0x1e8] sm:$0xff] }
 0x5f9   :  { %v607_v52 = vmul.f32 %v1960_v25, %v605_v51  ;;  %v391_v25 = vld [vmem:[#allocation10 + $0x70] sm:$0xff] }
 0x5fa   :  { %1047 = vmatpush.msra.mxu0 %v391_v25  ;;  %v1181_v51 = vld [vmem:[#allocation16 + $0x1f0] sm:$0xff]  ;;  %v1147_v25 = vld [vmem:[#allocation16 + $0xe0] sm:$0xff] }
 0x5fb   :  { %1883 = vmatmul.msk.f32.vlgmr.msrb.gmra.mxu2 %vm448_vm8, %v607_v52  ;;  %v1175_v52 = vld [vmem:[#allocation16 + $0x1c0] sm:$0xff] }
 0x5fc   :  { %877 = vmatpush.msrb.mxu2 %v388_v59  ;;  %1048 = vmatpush.msra.mxu0 %v390_v26  ;;  %v1148_v26 = vld [vmem:[#allocation16 + $0xe8] sm:$0xff] }
 0x5fe   :  { %878 = vmatpush.msrb.mxu2 %v387_v60  ;;  %1049 = vmatpush.msra.mxu0 %v389_v27  ;;  %v1149_v27 = vld [vmem:[#allocation16 + $0xf0] sm:$0xff] }
 0x600   :  { %879 = vmatpush.msrb.mxu2 %v386_v44  ;;  %v1172_v44 = vld [vmem:[#allocation16 + $0x1a8] sm:$0xff] }
 0x604   :  { %833 = vrot.lane.b32.xlu1 %v2474_v47, %s2315_s20  ;;  %v385_v47 = vld [vmem:[#allocation10 + $0x40] sm:$0xff] }
 0x605   :  { %880 = vmatpush.msrb.mxu2 %v385_v47  ;;  %v1173_v47 = vld [vmem:[#allocation16 + $0x1b0] sm:$0xff] }
 0x609   :  { %1927 = vrot.lane.b32.xlu0 %v1926_v21, %s2311_s16  ;;  %v1177_v21 = vld [vmem:[#allocation16 + $0x1d0] sm:$0xff] }
 0x65e   :  { %v962_v58 = vpop.xlane.xlu1 %961 }
 0x65f   :  { %1969 = vrcp.f32 %v962_v58 }
 0x660   :  { %v965_v57 = vpop.xlane.xlu0 %964 }
 0x661   :  { %1971 = vrcp.f32 %v965_v57 }
 0x665   :  { %v1970_v62 = vpop.eup %1969 }
 0x666   :  { %v968_v45 = vmul.f32 %v1970_v62, %v962_v58 }
 0x667   :  { %v1972_v38 = vpop.eup %1971 }
 0x668   :  { %v796_v61 = vpop.xlane.xlu0 %795  ;;  %v969_v43 = vmul.f32 %v1972_v38, %v965_v57  ;;  %v970_v9 = vsub.f32 2.0, %v968_v45  ;;  %v1163_v45 = vld [vmem:[#allocation16 + $0x160] sm:$0xff] }
 0x669   :  { %1973 = vrcp.f32 %v796_v61 }
 0x66a   :  { %v971_v5 = vsub.f32 2.0, %v969_v43  ;;  %v972_v15 = vmul.f32 %v1970_v62, %v970_v9  ;;  %v1174_v62 = vld [vmem:[#allocation16 + $0x1b8] sm:$0xff]  ;;  %v1159_v9 = vld [vmem:[#allocation16 + $0x140] sm:$0xff] }
 0x66b   :  { %v1170_v43 = vld [vmem:[#allocation16 + $0x198] sm:$0xff] }
 0x66c   :  { %v973_v13 = vmul.f32 %v1972_v38, %v971_v5  ;;  %v974_v22 = vmul.f32 %v2546_v36, %v972_v15  ;;  %v1167_v38 = vld [vmem:[#allocation16 + $0x180] sm:$0xff]  ;;  %v1166_v5 = vld [vmem:[#allocation16 + $0x178] sm:$0xff] }
 0x66d   :  { %v1155_v15 = vld [vmem:[#allocation16 + $0x120] sm:$0xff] }
 0x66e   :  { %v975_v20 = vmul.f32 %v1964_v39, %v973_v13  ;;  %v1162_v13 = vld [vmem:[#allocation16 + $0x158] sm:$0xff] }
 0x66f   :  { %v1974_v63 = vpop.eup %1973 }
 0x670   :  { %v800_v2 = vmul.f32 %v1974_v63, %v796_v61  ;;  %v1171_v61 = vld [vmem:[#allocation16 + $0x1a0] sm:$0xff] }
 0x672   :  { %v802_v3 = vsub.f32 2.0, %v800_v2  ;;  %v1169_v2 = vld [vmem:[#allocation16 + $0x190] sm:$0xff] }
 0x674   :  { %v804_v4 = vmul.f32 %v1974_v63, %v802_v3  ;;  %v1168_v63 = vld [vmem:[#allocation16 + $0x188] sm:$0xff] }
 0x675   :  { %v1164_v3 = vld [vmem:[#allocation16 + $0x168] sm:$0xff] }
 0x676   :  { %v806_v11 = vmul.f32 %v1966_v42, %v804_v4  ;;  %v834_v12 = vpop.permute.xlu1 %833  ;;  %v1165_v4 = vld [vmem:[#allocation16 + $0x170] sm:$0xff] }
 0x677   :  { %854 = vmatpush.msrb.mxu1 %v834_v12  ;;  %v1161_v12 = vld [vmem:[#allocation16 + $0x150] sm:$0xff] }
 0x678   :  { %1894 = vmatmul.msk.f32.vlgmr.msrb.gmra.mxu1 %vm448_vm8, %v806_v11  ;;  %v1160_v11 = vld [vmem:[#allocation16 + $0x148] sm:$0xff] }
 0x67b   :  { %v1928_v16 = vpop.permute.xlu0 %1927 }
 0x67c   :  { %v1930_v18 = vunpack.i.h.bf16 %v1928_v16  ;;  %v1929_v19 = vunpack.i.l.bf16 %v1928_v16  ;;  %v1156_v16 = vld [vmem:[#allocation16 + $0x128] sm:$0xff] }
 0x67e   :  { %v633_v23 = vpop.f32.mrf.mxu2  ;;  %997 = vmatpush.msra.mxu1 %v1929_v19  ;;  %1023 = vmatpush.msra.mxu3 %v1930_v18  ;;  %v1157_v18 = vld [vmem:[#allocation16 + $0x130] sm:$0xff]  ;;  %v1158_v19 = vld [vmem:[#allocation16 + $0x138] sm:$0xff] }
 0x67f   :  { %1885 = vmatmul.msk.f32.vlgmr.msra.gmra.mxu2 %vm393_vm7, %v633_v23  ;;  %1902 = vmatmul.msk.f32.vlgmr.msra.gmra.mxu3 %vm448_vm8, %v975_v20  ;;  %v1151_v20 = vld [vmem:[#allocation16 + $0x100] sm:$0xff]  ;;  %v1153_v23 = vld [vmem:[#allocation16 + $0x110] sm:$0xff] }
 0x680   :  { %1901 = vmatmul.msk.f32.vlgmr.msra.gmra.mxu1 %vm448_vm8, %v974_v22  ;;  %1239 = vmatpush.msrb.mxu3 %v1181_v51  ;;  %v1152_v22 = vld [vmem:[#allocation16 + $0x108] sm:$0xff]  ;;  %v1130_v51 = vld [vmem:[#allocation16 + $0x58] sm:$0xff] }
 0x681   :  { %1216 = vmatpush.msrb.mxu1 %v1180_v50  ;;  %v1129_v50 = vld [vmem:[#allocation16 + $0x50] sm:$0xff] }
 0x682   :  { %1240 = vmatpush.msrb.mxu3 %v1177_v21  ;;  %v1126_v21 = vld [vmem:[#allocation16 + $0x38] sm:$0xff] }
 0x684   :  { %1241 = vmatpush.msrb.mxu3 %v1173_v47 }
 0x686   :  { %1242 = vmatpush.msrb.mxu3 %v1169_v2 }
 0x687   :  { %1886 = vmatmul.msk.f32.gmra.mxu2 %vm393_vm7, %v2538_v10 }
 0x688   :  { %1243 = vmatpush.msrb.mxu3 %v1165_v4 }
 0x68a   :  { %1244 = vmatpush.msrb.mxu3 %v1161_v12 }
 0x68c   :  { %1245 = vmatpush.msrb.mxu3 %v1157_v18 }
 0x68e   :  { %1246 = vmatpush.msrb.mxu3 %v1153_v23 }
 0x68f   :  { %1895 = vmatmul.msk.f32.vlgmr.msrb.gmra.mxu2 %vm393_vm7, %v2536_v8 }
 0x690   :  { %1247 = vmatpush.msrb.mxu3 %v1149_v27 }
 0x6f5   :  { %v856_v28 = vpop.f32.mrf.mxu1 }
 0x6f6   :  { %1896 = vmatmul.msk.f32.gmra.mxu2 %vm393_vm7, %v856_v28  ;;  %v1150_v28 = vld [vmem:[#allocation16 + $0xf8] sm:$0xff] }
 0x6fd   :  { %v999_v29 = vpop.f32.mrf.mxu1 }
 0x6fe   :  { %1903 = vmatmul.msk.f32.vlgmr.msra.gmra.mxu0 %vm393_vm7, %v999_v29  ;;  %v1143_v29 = vld [vmem:[#allocation16 + $0xc0] sm:$0xff] }
 0x702   :  { %v1025_v30 = vpop.f32.mrf.mxu3  ;;  %v686_v10 = vpop.f32.mrf.mxu2 }
 0x703   :  { %v716_v32 = vadd.f32 %v2532_v6, %v686_v10  ;;  %v1179_v6 = vld [vmem:[#allocation16 + $0x1e0] sm:$0xff]  ;;  %v1145_v10 = vld [vmem:[#allocation16 + $0xd0] sm:$0xff] }
 0x704   :  { %1193 = vmatpush.msra.mxu2 %v1179_v6  ;;  %1248 = vmatpush.msrb.mxu3 %v1145_v10  ;;  %v1128_v6 = vld [vmem:[#allocation16 + $0x48] sm:$0xff] }
 0x706   :  { %1904 = vmatmul.msk.f32.gmra.mxu0 %vm393_vm7, %v1025_v30  ;;  %1194 = vmatpush.msra.mxu2 %v1175_v52  ;;  %v1144_v30 = vld [vmem:[#allocation16 + $0xc8] sm:$0xff] }
 0x707   :  { %v1124_v52 = vld [vmem:[#allocation16 + $0x28] sm:$0xff] }
 0x708   :  { %1195 = vmatpush.msra.mxu2 %v1171_v61 }
 0x70a   :  { %v689_v31 = vpop.f32.mrf.mxu2  ;;  %1196 = vmatpush.msra.mxu2 %v1167_v38 }
 0x70b   :  { %v719_v39 = vadd.f32 %v2534_v7, %v689_v31  ;;  %v1182_v7 = vld [vmem:[#allocation16 + $0x1f8] sm:$0xff] }
 0x70c   :  { %1262 = vmatpush.msrb.mxu0 %v1182_v7  ;;  %1197 = vmatpush.msra.mxu2 %v1163_v45  ;;  %v1146_v31 = vld [vmem:[#allocation16 + $0xd8] sm:$0xff]  ;;  %v1123_v7 = vld [vmem:[#allocation16 + $0x20] sm:$0xff] }
 0x70e   :  { %1263 = vmatpush.msrb.mxu0 %v1178_v53  ;;  %1198 = vmatpush.msra.mxu2 %v1159_v9  ;;  %v1119_v53 = vld [vmem:[#allocation16] sm:$0xff] }
 0x710   :  { %1264 = vmatpush.msrb.mxu0 %v1174_v62  ;;  %1199 = vmatpush.msra.mxu2 %v1155_v15 }
 0x712   :  { %v882_v8 = vpop.f32.mrf.mxu2  ;;  %1265 = vmatpush.msrb.mxu0 %v1170_v43  ;;  %1200 = vmatpush.msra.mxu2 %v1151_v20 }
 0x713   :  { %v888_v33 = vadd.f32 %v882_v8, %v716_v32  ;;  %v1139_v8 = vld [vmem:[#allocation16 + $0xa0] sm:$0xff]  ;;  %v1140_v32 = vld [vmem:[#allocation16 + $0xa8] sm:$0xff] }
 0x714   :  { %1266 = vmatpush.msrb.mxu0 %v1166_v5  ;;  %1201 = vmatpush.msra.mxu2 %v1147_v25  ;;  %v1934_v5 = vld [vmem:[#allocation13] ss:$0 sm:$0xff] }
 0x716   :  { %1267 = vmatpush.msrb.mxu0 %v1162_v13  ;;  %1202 = vmatpush.msra.mxu2 %v1143_v29  ;;  %v1935_v13 = vld [vmem:[#allocation14] ss:$0 sm:$0xff] }
 0x718   :  { %1268 = vmatpush.msrb.mxu0 %v1158_v19  ;;  %1203 = vmatpush.msra.mxu2 %v1139_v8 }
 0x71a   :  { %1269 = vmatpush.msrb.mxu0 %v1154_v24 }
 0x71c   :  { %1270 = vmatpush.msrb.mxu0 %v1150_v28 }
 0x71e   :  { %1271 = vmatpush.msrb.mxu0 %v1146_v31 }
 0x779   :  { %v885_v37 = vpop.f32.mrf.mxu2 }
 0x77a   :  { %v889_v41 = vadd.f32 %v885_v37, %v719_v39  ;;  %v1138_v37 = vld [vmem:[#allocation16 + $0x98] sm:$0xff]  ;;  %v1131_v39 = vld [vmem:[#allocation16 + $0x60] sm:$0xff] }
 0x77b   :  { %v1051_v34 = vpop.f32.mrf.mxu0 }
 0x77c   :  { %v1057_v35 = vadd.f32 %v1051_v34, %v888_v33  ;;  %v1141_v33 = vld [vmem:[#allocation16 + $0xb0] sm:$0xff]  ;;  %v1135_v34 = vld [vmem:[#allocation16 + $0x80] sm:$0xff] }
 0x77d   :  { %1249 = vmatpush.msrb.mxu3 %v1141_v33  ;;  %1204 = vmatpush.msra.mxu2 %v1135_v34 }
 0x77e   :  { %v1063_v36 = vadd.f32 %v1933_v17, %v1057_v35  ;;  %v1136_v35 = vld [vmem:[#allocation16 + $0x88] sm:$0xff] }
 0x77f   :  { %1205 = vmatpush.msra.mxu2 %v1131_v39 }
 0x780   :  { %v2573_v40 = vadd.f32 %v1063_v36, %v2428_v0  ;;  %v1176_v0 = vld [vmem:[#allocation16 + $0x1c8] sm:$0xff]  ;;  %v1137_v36 = vld [vmem:[#allocation16 + $0x90] sm:$0xff] }
 0x781   :  { %1217 = vmatpush.msrb.mxu1 %v1176_v0  ;;  %1250 = vmatpush.msrb.mxu3 %v1137_v36  ;;  %v1125_v0 = vld [vmem:[#allocation16 + $0x30] sm:$0xff] }
 0x782   :  { %1069 = vadd.xlane.f32.xlu2 %v2573_v40 }
 0x783   :  { %v1054_v42 = vpop.f32.mrf.mxu0  ;;  %1218 = vmatpush.msrb.mxu1 %v1172_v44 }
 0x784   :  { %v1058_v46 = vadd.f32 %v1054_v42, %v889_v41  ;;  %v1132_v41 = vld [vmem:[#allocation16 + $0x68] sm:$0xff]  ;;  %v1133_v42 = vld [vmem:[#allocation16 + $0x70] sm:$0xff] }
 0x785   :  { %1219 = vmatpush.msrb.mxu1 %v1168_v63  ;;  %1251 = vmatpush.msrb.mxu3 %v1133_v42 }
 0x786   :  { %v1064_v48 = vadd.f32 %v1933_v17, %v1058_v46  ;;  %v1142_v17 = vld [vmem:[#allocation16 + $0xb8] sm:$0xff] }
 0x787   :  { %1220 = vmatpush.msrb.mxu1 %v1164_v3  ;;  %1272 = vmatpush.msrb.mxu0 %v1142_v17  ;;  %v1134_v46 = vld [vmem:[#allocation16 + $0x78] sm:$0xff] }
 0x788   :  { %v2577_v49 = vadd.f32 %v1064_v48, %v2431_v1  ;;  %v1127_v48 = vld [vmem:[#allocation16 + $0x40] sm:$0xff]  ;;  %1252 = vmatpush.msrb.mxu3 %v1129_v50 }
 0x789   :  { %1221 = vmatpush.msrb.mxu1 %v1160_v11  ;;  %1273 = vmatpush.msrb.mxu0 %v1138_v37 }
 0x78a   :  { %1071 = vadd.xlane.f32.xlu1 %v2577_v49  ;;  %1206 = vmatpush.msra.mxu2 %v1127_v48 }
 0x78b   :  { %1222 = vmatpush.msrb.mxu1 %v1156_v16  ;;  %1274 = vmatpush.msrb.mxu0 %v1134_v46 }
 0x78c   :  { %1207 = vmatpush.msra.mxu2 %v1123_v7  ;;  %1253 = vmatpush.msrb.mxu3 %v1125_v0 }
 0x78d   :  { %1223 = vmatpush.msrb.mxu1 %v1152_v22  ;;  %1275 = vmatpush.msrb.mxu0 %v1130_v51 }
 0x78e   :  { %1208 = vmatpush.msra.mxu2 %v1119_v53 }
 0x78f   :  { %1224 = vmatpush.msrb.mxu1 %v1148_v26  ;;  %1276 = vmatpush.msrb.mxu0 %v1126_v21  ;;  %v2316_v21 = vmov -1.0  }
 0x791   :  { %1225 = vmatpush.msrb.mxu1 %v1144_v30 }
 0x793   :  { %1226 = vmatpush.msrb.mxu1 %v1140_v32 }
 0x795   :  { %1227 = vmatpush.msrb.mxu1 %v1136_v35 }
 0x797   :  { %1228 = vmatpush.msrb.mxu1 %v1132_v41 }
 0x799   :  { %1229 = vmatpush.msrb.mxu1 %v1128_v6 }
 0x79b   :  { %1230 = vmatpush.msrb.mxu1 %v1124_v52 }
 0x7f5   :  { %v1070_v1 = vpop.xlane.xlu2 %1069 }
 0x7f6   :  { %v1073_v54 = vmul.f32 %v1070_v1, %v2434_v14  ;;  %v1120_v1 = vld [vmem:[#allocation16 + $0x8] sm:$0xff] }
 0x7f7   :  { %1231 = vmatpush.msrb.mxu1 %v1120_v1 }
 0x7f8   :  { %v2582_v55 = vsub.f32 %v2573_v40, %v1073_v54  ;;  %v1121_v54 = vld [vmem:[#allocation16 + $0x10] sm:$0xff] }
 0x7f9   :  { %1254 = vmatpush.msrb.mxu3 %v1121_v54 }
 0x7fa   :  { %v1077_v56 = vmul.f32 %v2582_v55, %v2582_v55 }
 0x7fc   :  { %1079 = vadd.xlane.f32.xlu0 %v1077_v56  ;;  %v1122_v56 = vld [vmem:[#allocation16 + $0x18] sm:$0xff] }
 0x7fd   :  { %v1072_v57 = vpop.xlane.xlu1 %1071  ;;  %1277 = vmatpush.msrb.mxu0 %v1122_v56 }
 0x7fe   :  { %v1074_v58 = vmul.f32 %v1072_v57, %v2434_v14 }
 0x800   :  { %v2588_v59 = vsub.f32 %v2577_v49, %v1074_v58 }
 0x802   :  { %v1078_v60 = vmul.f32 %v2588_v59, %v2588_v59 }
 0x804   :  { %1081 = vadd.xlane.f32.xlu2 %v1078_v60 }
 0x86f   :  { %v1080_v57 = vpop.xlane.xlu0 %1079 }
 0x870   :  { %v1083_v58 = vmul.f32 %v1080_v57, %v2434_v14 }
 0x872   :  { %v1085_v60 = vadd.f32 1e-06, %v1083_v58 }
 0x874   :  { %1975 = vrsqrt.f32 %v1085_v60  ;;  %vm1093_vm10 = vweird.f32 %v1085_v60 }
 0x877   :  { %v1082_v61 = vpop.xlane.xlu2 %1081 }
 0x878   :  { %v1084_v44 = vmul.f32 %v1082_v61, %v2434_v14 }
 0x87a   :  { %v1976_v47 = vpop.eup %1975  ;;  %v1086_v62 = vadd.f32 1e-06, %v1084_v44 }
 0x87b   :  { %v1088_v38 = vmul.f32 %v1976_v47, %v1085_v60  ;;  %vm1094_vm9 = vweird.f32 %v1976_v47 }
 0x87c   :  { %1977 = vrsqrt.f32 %v1086_v62  ;;  %vm1095_vm11 = vmor %vm1093_vm10, %vm1094_vm9  ;;  %vm1103_vm13 = vweird.f32 %v1086_v62 }
 0x87d   :  { %v1089_v63 = vmul.f32 %v1976_v47, %v1088_v38 }
 0x87f   :  { %v1090_v2 = vmul.f32 0.5, %v1089_v63 }
 0x881   :  { %v1091_v43 = vsub.f32 1.5, %v1090_v2 }
 0x882   :  { %v1978_v45 = vpop.eup %1977 }
 0x883   :  { %v1092_v3 = vmul.f32 %v1976_v47, %v1091_v43  ;;  %v1098_v4 = vmul.f32 %v1978_v45, %v1086_v62  ;;  %vm1104_vm12 = vweird.f32 %v1978_v45 }
 0x884   :  { %vm1105_vm14 = vmor %vm1103_vm13, %vm1104_vm12 }
 0x885   :  { %v1096_v9 = vsel %vm1095_vm11, %v1976_v47, %v1092_v3  ;;  %v1099_v11 = vmul.f32 %v1978_v45, %v1098_v4 }
 0x886   :  { %v1107_v12 = vmul.f32 %v1096_v9, %v2582_v55  ;;  %v2599_v55 = vld [vmem:[%s3002_s10] sm:$0xf]  ;;  %v1668_v9 = vld [vmem:[#allocation17 + $0x1f8] sm:$0xff] }
 0x887   :  { %v1100_v14 = vmul.f32 0.5, %v1099_v11  ;;  %v1186_v25 = vperm.slane %v2599_v55, 1  ;;  %v1188_v26 = vperm.slane %v2599_v55, 3  ;;  %v1185_v10 = vperm.slane %v2599_v55, 0  ;;  %1742 = vmatpush.msra.mxu0 %v1668_v9 }
 0x888   :  { %v1112_v15 = vmul.f32 %v1934_v5, %v1107_v12  ;;  %v1187_v8 = vperm.slane %v2599_v55, 2  ;;  %v1665_v55 = vld [vmem:[#allocation17 + $0x1e0] sm:$0xff] }
 0x889   :  { %v1101_v16 = vsub.f32 1.5, %v1100_v14 }
 0x88a   :  { %v1117_v18 = vadd.f32 %v1935_v13, %v1112_v15 }
 0x88b   :  { %v1102_v19 = vmul.f32 %v1978_v45, %v1101_v16 }
 0x88c   :  { %1209 = vmatmul.f32.vlgmr.msra.gmra.mxu2 %v1117_v18  ;;  %1232 = vmatmul.f32.vlgmr.msrb.gmra.mxu1 %v1117_v18 }
 0x88d   :  { %v1106_v20 = vsel %vm1105_vm14, %v1978_v45, %v1102_v19  ;;  %1255 = vmatmul.f32.vlgmr.msrb.gmra.mxu3 %v1117_v18  ;;  %1278 = vmatmul.f32.vlgmr.msrb.gmra.mxu0 %v1117_v18  ;;  %v1635_v19 = vld [vmem:[#allocation17 + $0xf0] sm:$0xff] }
 0x88e   :  { %v1108_v22 = vmul.f32 %v1106_v20, %v2588_v59 }
 0x890   :  { %v1113_v23 = vmul.f32 %v1934_v5, %v1108_v22  ;;  %v1636_v5 = vld [vmem:[#allocation17 + $0xf8] sm:$0xff] }
 0x891   :  { %1696 = vmatpush.msra.mxu1 %v1636_v5 }
 0x892   :  { %v1118_v24 = vadd.f32 %v1935_v13, %v1113_v23 }
 0x893   :  { %1697 = vmatpush.msra.mxu1 %v1635_v19 }
 0x894   :  { %1212 = vmatmul.f32.gmra.mxu2 %v1118_v24  ;;  %1235 = vmatmul.f32.gmra.mxu1 %v1118_v24 }
 0x895   :  { %1258 = vmatmul.f32.gmra.mxu3 %v1118_v24  ;;  %1281 = vmatmul.f32.gmra.mxu0 %v1118_v24  ;;  %v1667_v24 = vld [vmem:[#allocation17 + $0x1f0] sm:$0xff] }
 0x896   :  { %1743 = vmatpush.msra.mxu0 %v1667_v24 }
 0x909   :  { %v1233_v27 = vpop.f32.mrf.mxu1 }
 0x90a   :  { %v1234_v28 = vadd.f32 %v1233_v27, %v1186_v25  ;;  %v1279_v59 = vpop.f32.mrf.mxu0 }
 0x90b   :  { %v1280_v29 = vadd.f32 %v1279_v59, %v1188_v26 }
 0x90c   :  { %v1294_v30 = vmul.f32 0.70710677, %v1234_v28  ;;  %v2626_v7 = vmul.f32 0.5, %v1234_v28 }
 0x90d   :  { %v1296_v31 = vmul.f32 0.70710677, %v1280_v29  ;;  %v2628_v0 = vmul.f32 0.5, %v1280_v29  ;;  %v1634_v29 = vld [vmem:[#allocation17 + $0xe8] sm:$0xff] }
 0x90e   :  { %v1318_v32 = vand.u32 2147483647, %v1294_v30  ;;  %vm1302_vm15 = vcmp.ge.f32.partialorder %v1294_v30, 0.0  ;;  %v1666_v30 = vld [vmem:[#allocation17 + $0x1e8] sm:$0xff]  ;;  %1698 = vmatpush.msra.mxu1 %v1634_v29 }
 0x90f   :  { %v1320_v33 = vand.u32 2147483647, %v1296_v31  ;;  %v1210_v17 = vpop.f32.mrf.mxu2  ;;  %vm1304_vm0 = vcmp.ge.f32.partialorder %v1296_v31, 0.0  ;;  %v2631_v53 = vsel %vm1302_vm15, 1.0, %v2316_v21  ;;  %1744 = vmatpush.msra.mxu0 %v1666_v30 }
 0x910   :  { %v1326_v34 = vmul.f32 0.3275911, %v1318_v32  ;;  %v1211_v35 = vadd.f32 %v1210_v17, %v1185_v10  ;;  %v1256_v36 = vpop.f32.mrf.mxu3  ;;  %v1534_v48 = vsub.f32 0.0, %v1318_v32  ;;  %v2634_v1 = vsel %vm1304_vm0, 1.0, %v2316_v21 }
 0x911   :  { %v1328_v37 = vmul.f32 0.3275911, %v1320_v33  ;;  %v1257_v39 = vadd.f32 %v1256_v36, %v1187_v8  ;;  %v1536_v50 = vsub.f32 0.0, %v1320_v33  ;;  %v1236_v2 = vpop.f32.mrf.mxu1  ;;  %v1620_v36 = vld [vmem:[#allocation17 + $0x78] sm:$0xff]  ;;  %1745 = vmatpush.msra.mxu0 %v1665_v55 }
 0x912   :  { %v2613_v41 = vadd.f32 1.0, %v1326_v34  ;;  %v2617_v46 = vmul.f32 0.70710677, %v1211_v35  ;;  %v1542_v52 = vmul.f32 %v1534_v48, %v1318_v32  ;;  %v2643_v60 = vmul.f32 0.5, %v1211_v35  ;;  %v1282_v4 = vpop.f32.mrf.mxu0  ;;  %1673 = vmatpush.msrb.mxu2 %v1620_v36 }
 0x913   :  { %v2615_v42 = vadd.f32 1.0, %v1328_v37  ;;  %v2621_v6 = vmul.f32 0.70710677, %v1257_v39  ;;  %v1544_v58 = vmul.f32 %v1536_v50, %v1320_v33  ;;  %v2645_v61 = vmul.f32 0.5, %v1257_v39 }
 0x914   :  { %1979 = vrcp.f32 %v2613_v41  ;;  %v2624_v51 = vand.u32 2147483647, %v2617_v46  ;;  %vm1361_vm1 = vweird.f32 %v2613_v41  ;;  %v1365_v62 = vand.u32 2147483647, %v2613_v41 }
 0x915   :  { %1981 = vrcp.f32 %v2615_v42  ;;  %v2638_v56 = vand.u32 2147483647, %v2621_v6  ;;  %v1367_v38 = vand.u32 2147483648, %v2613_v41  ;;  %v1551_v43 = vmul.f32 1.442695, %v1542_v52 }
 0x916   :  { %v1325_v54 = vmul.f32 0.3275911, %v2624_v51  ;;  %vm1391_vm2 = vweird.f32 %v2615_v42  ;;  %v1395_v12 = vand.u32 2147483647, %v2615_v42  ;;  %v1397_v13 = vand.u32 2147483648, %v2615_v42 }
 0x917   :  { %v1327_v3 = vmul.f32 0.3275911, %v2638_v56  ;;  %v1555_v15 = vmul.f32 1.442695, %v1544_v58  ;;  %v2666_v18 = vadd.f32 %v1236_v2, %v1186_v25  ;;  %vm2670_vm4 = vcmp.eq.f32.partialorder %v1365_v62, 8.507059e+37  ;;  %v1213_v28 = vpop.f32.mrf.mxu2  ;;  %v1632_v62 = vld [vmem:[#allocation17 + $0xd8] sm:$0xff] }
 0x918   :  { %v2653_v63 = vadd.f32 1.0, %v1325_v54  ;;  %v2676_v23 = vadd.f32 %v1282_v4, %v1188_v26  ;;  %v1368_v27 = vor.u32 1.1754944e-38, %v1367_v38  ;;  %v1259_v59 = vpop.f32.mrf.mxu3  ;;  %vm2681_vm6 = vcmp.eq.f32.partialorder %v1395_v12, 8.507059e+37  ;;  %v1633_v54 = vld [vmem:[#allocation17 + $0xe0] sm:$0xff] }
 0x919   :  { %v2662_v16 = vadd.f32 1.0, %v1327_v3  ;;  %v1398_v26 = vor.u32 1.1754944e-38, %v1397_v13  ;;  %v2697_v35 = vmul.f32 0.70710677, %v2666_v18  ;;  %v2717_v50 = vadd.f32 %v1213_v28, %v1185_v10  ;;  %1699 = vmatpush.msra.mxu1 %v1633_v54  ;;  %v1664_v3 = vld [vmem:[#allocation17 + $0x1d8] sm:$0xff]  ;;  %v1631_v28 = vld [vmem:[#allocation17 + $0xd0] sm:$0xff] }
 0x91a   :  { %v2640_v57 = vpop.eup %1979  ;;  %1983 = vrcp.f32 %v2653_v63  ;;  %v1350_v34 = vand.u32 2147483647, %v2653_v63  ;;  %v2713_v48 = vmul.f32 0.70710677, %v2676_v23  ;;  %v2721_v52 = vadd.f32 %v1259_v59, %v1187_v8  ;;  %v1619_v8 = vld [vmem:[#allocation17 + $0x70] sm:$0xff]  ;;  %1746 = vmatpush.msra.mxu0 %v1664_v3  ;;  %v1650_v59 = vld [vmem:[#allocation17 + $0x168] sm:$0xff] }
 0x91b   :  { %v2647_v44 = vpop.eup %1981  ;;  %v1357_v47 = vmul.f32 %v2640_v57, %v2613_v41  ;;  %vm1362_vm3 = vweird.f32 %v2640_v57  ;;  %1985 = vpow2.f32 %v1551_v43  ;;  %v1533_v10 = vsub.f32 0.0, %v2624_v51  ;;  %1674 = vmatpush.msrb.mxu2 %v1619_v8  ;;  %1700 = vmatpush.msra.mxu1 %v1632_v62  ;;  %v1630_v41 = vld [vmem:[#allocation17 + $0xc8] sm:$0xff]  ;;  %v1649_v54 = vld [vmem:[#allocation17 + $0x160] sm:$0xff] }
 0x91c   :  { %v1387_v45 = vmul.f32 %v2647_v44, %v2615_v42  ;;  %vm1392_vm5 = vweird.f32 %v2647_v44  ;;  %1987 = vrcp.f32 %v2662_v16  ;;  %vm2690_vm7 = vmor %vm1361_vm1, %vm1362_vm3  ;;  %v1352_v43 = vand.u32 2147483648, %v2653_v63  ;;  %v1662_v62 = vld [vmem:[#allocation17 + $0x1c8] sm:$0xff]  ;;  %v1661_v3 = vld [vmem:[#allocation17 + $0x1c0] sm:$0xff] }
 0x91d   :  { %v1358_v11 = vsub.f32 1.0, %v1357_v47  ;;  %1989 = vpow2.f32 %v1555_v15  ;;  %vm2708_vm8 = vmor %vm1391_vm2, %vm1392_vm5  ;;  %vm2743_vm9 = vcmp.eq.f32.partialorder %v1350_v34, 8.507059e+37  ;;  %v2748_v12 = vand.u32 2147483647, %v2697_v35  ;;  %1701 = vmatpush.msra.mxu1 %v1631_v28  ;;  %v1644_v28 = vld [vmem:[#allocation17 + $0x138] sm:$0xff] }
 0x91e   :  { %v1388_v14 = vsub.f32 1.0, %v1387_v45  ;;  %v1651_v45 = vld [vmem:[#allocation17 + $0x170] sm:$0xff]  ;;  %vm1346_vm10 = vweird.f32 %v2653_v63  ;;  %v1380_v15 = vand.u32 2147483647, %v2662_v16  ;;  %v2755_v19 = vand.u32 2147483647, %v2713_v48 }
 0x91f   :  { %v1359_v20 = vmul.f32 %v2640_v57, %v1358_v11  ;;  %vm1301_vm11 = vcmp.ge.f32.partialorder %v2617_v46, 0.0  ;;  %v1353_v30 = vor.u32 1.1754944e-38, %v1352_v43  ;;  %vm1303_vm13 = vcmp.ge.f32.partialorder %v2621_v6, 0.0  ;;  %1702 = vmatpush.msra.mxu1 %v1630_v41  ;;  %v1660_v11 = vld [vmem:[#allocation17 + $0x1b8] sm:$0xff]  ;;  %v1646_v41 = vld [vmem:[#allocation17 + $0x148] sm:$0xff]  ;;  %v1657_v6 = vld [vmem:[#allocation17 + $0x1a0] sm:$0xff] }
 0x920   :  { %v1389_v25 = vmul.f32 %v2647_v44, %v1388_v14  ;;  %v2699_v37 = vpop.eup %1983  ;;  %v1332_v32 = vmul.f32 0.3275911, %v2755_v19  ;;  %v1382_v36 = vand.u32 2147483648, %v2662_v16  ;;  %vm1376_vm0 = vweird.f32 %v2662_v16 }
 0x921   :  { %v1360_v31 = vadd.f32 %v2640_v57, %v1359_v20  ;;  %v1342_v47 = vmul.f32 %v2699_v37, %v2653_v63  ;;  %v2740_v4 = vpop.eup %1985  ;;  %vm1347_vm12 = vweird.f32 %v2699_v37  ;;  %vm2799_vm1 = vcmp.eq.f32.partialorder %v1380_v15, 8.507059e+37 }
 0x922   :  { %v1390_v17 = vadd.f32 %v2647_v44, %v1389_v25  ;;  %v2750_v13 = vpop.eup %1987  ;;  %v1618_v25 = vld [vmem:[#allocation17 + $0x68] sm:$0xff]  ;;  %vm2775_vm14 = vmor %vm1346_vm10, %vm1347_vm12  ;;  %v2782_v8 = vadd.f32 1.0, %v1332_v32  ;;  %v2809_v32 = vmul.f32 0.70710677, %v2717_v50  ;;  %v2845_v46 = vsel %vm1303_vm13, 1.0, %v2316_v21 }
 0x923   :  { %v1364_v39 = vsel %vm2690_vm7, %v2640_v57, %v1360_v31  ;;  %v1652_v57 = vld [vmem:[#allocation17 + $0x178] sm:$0xff]  ;;  %v1343_v9 = vsub.f32 1.0, %v1342_v47  ;;  %v2757_v20 = vpop.eup %1989  ;;  %v1330_v31 = vmul.f32 0.3275911, %v2748_v12  ;;  %1675 = vmatpush.msrb.mxu2 %v1618_v25  ;;  %v1541_v47 = vmul.f32 %v1533_v10, %v2624_v51  ;;  %v1629_v51 = vld [vmem:[#allocation17 + $0xc0] sm:$0xff] }
 0x924   :  { %v2725_v42 = vsel %vm2670_vm4, %v1368_v27, %v1364_v39  ;;  %v1394_v58 = vsel %vm2708_vm8, %v2647_v44, %v1390_v17  ;;  %1719 = vmatpush.msra.mxu3 %v1652_v57  ;;  %v1535_v44 = vsub.f32 0.0, %v2638_v56  ;;  %v1372_v27 = vmul.f32 %v2750_v13, %v2662_v16  ;;  %v1617_v39 = vld [vmem:[#allocation17 + $0x60] sm:$0xff]  ;;  %v1648_v10 = vld [vmem:[#allocation17 + $0x158] sm:$0xff]  ;;  %1703 = vmatpush.msra.mxu1 %v1629_v51  ;;  %v1658_v51 = vld [vmem:[#allocation17 + $0x1a8] sm:$0xff] }
 0x925   :  { %v1462_v38 = vmul.f32 1.0614054, %v2725_v42  ;;  %v2736_v2 = vsel %vm2681_vm6, %v1398_v26, %v1394_v58  ;;  %v1344_v24 = vmul.f32 %v2699_v37, %v1343_v9  ;;  %v1663_v26 = vld [vmem:[#allocation17 + $0x1d0] sm:$0xff]  ;;  %v2780_v55 = vadd.f32 1.0, %v1330_v31  ;;  %1676 = vmatpush.msrb.mxu2 %v1617_v39 }
 0x926   :  { %v1464_v5 = vmul.f32 1.0614054, %v2736_v2  ;;  %1720 = vmatpush.msra.mxu3 %v1651_v45  ;;  %v1373_v34 = vsub.f32 1.0, %v1372_v27  ;;  %1747 = vmatpush.msra.mxu0 %v1663_v26  ;;  %vm1377_vm15 = vweird.f32 %v2750_v13  ;;  %v1383_v31 = vor.u32 1.1754944e-38, %v1382_v36 }
 0x927   :  { %v1470_v14 = vadd.f32 -1.4531521, %v1462_v38  ;;  %v1345_v17 = vadd.f32 %v2699_v37, %v1344_v24  ;;  %v1616_v38 = vld [vmem:[#allocation17 + $0x58] sm:$0xff]  ;;  %1991 = vrcp.f32 %v2780_v55  ;;  %vm1378_vm2 = vmor %vm1376_vm0, %vm1377_vm15  ;;  %v1543_v39 = vmul.f32 %v1535_v44, %v2638_v56 }
 0x928   :  { %v1472_v22 = vadd.f32 -1.4531521, %v1464_v5  ;;  %1721 = vmatpush.msra.mxu3 %v1650_v59  ;;  %v1374_v63 = vmul.f32 %v2750_v13, %v1373_v34  ;;  %1748 = vmatpush.msra.mxu0 %v1662_v62  ;;  %v1614_v59 = vld [vmem:[#allocation17 + $0x48] sm:$0xff]  ;;  %1993 = vrcp.f32 %v2782_v8  ;;  %v1549_v34 = vmul.f32 1.442695, %v1541_v47 }
 0x929   :  { %v1478_v29 = vmul.f32 %v1470_v14, %v2725_v42  ;;  %v1349_v45 = vsel %vm2775_vm14, %v2699_v37, %v1345_v17  ;;  %1677 = vmatpush.msrb.mxu2 %v1616_v38  ;;  %v1615_v37 = vld [vmem:[#allocation17 + $0x50] sm:$0xff]  ;;  %v1628_v14 = vld [vmem:[#allocation17 + $0xb8] sm:$0xff]  ;;  %v2813_v17 = vmul.f32 0.70710677, %v2721_v52  ;;  %v2827_v47 = vand.u32 2147483647, %v2809_v32 }
 0x92a   :  { %v1480_v33 = vmul.f32 %v1472_v22, %v2736_v2  ;;  %1722 = vmatpush.msra.mxu3 %v1649_v54  ;;  %v2792_v9 = vsel %vm2743_vm9, %v1353_v30, %v1349_v45  ;;  %v1647_v22 = vld [vmem:[#allocation17 + $0x150] sm:$0xff]  ;;  %v1375_v25 = vadd.f32 %v2750_v13, %v1374_v63  ;;  %1749 = vmatpush.msra.mxu0 %v1661_v3  ;;  %v1613_v54 = vld [vmem:[#allocation17 + $0x40] sm:$0xff]  ;;  %v1626_v38 = vld [vmem:[#allocation17 + $0xa8] sm:$0xff]  ;;  %v2834_v44 = vsel %vm1301_vm11, 1.0, %v2316_v21 }
 0x92b   :  { %v1486_v57 = vadd.f32 1.4214138, %v1478_v29  ;;  %v1461_v27 = vmul.f32 1.0614054, %v2792_v9  ;;  %v1627_v29 = vld [vmem:[#allocation17 + $0xb0] sm:$0xff]  ;;  %1678 = vmatpush.msrb.mxu2 %v1615_v37  ;;  %1704 = vmatpush.msra.mxu1 %v1628_v14  ;;  %1995 = vpow2.f32 %v1549_v34  ;;  %vm1421_vm4 = vweird.f32 %v2780_v55 }
 0x92c   :  { %v1488_v43 = vadd.f32 1.4214138, %v1480_v33  ;;  %1723 = vmatpush.msra.mxu3 %v1648_v10  ;;  %v1379_v33 = vsel %vm1378_vm2, %v2750_v13, %v1375_v25  ;;  %1750 = vmatpush.msra.mxu0 %v1660_v11  ;;  %v1659_v13 = vld [vmem:[#allocation17 + $0x1b0] sm:$0xff]  ;;  %v2837_v63 = vand.u32 2147483647, %v2813_v17  ;;  %v1625_v25 = vld [vmem:[#allocation17 + $0xa0] sm:$0xff]  ;;  %vm1451_vm7 = vweird.f32 %v2782_v8 }
 0x92d   :  { %v1494_v5 = vmul.f32 %v1486_v57, %v2725_v42  ;;  %v1469_v26 = vadd.f32 -1.4531521, %v1461_v27  ;;  %v2818_v36 = vsel %vm2799_vm1, %v1383_v31, %v1379_v33  ;;  %1679 = vmatpush.msrb.mxu2 %v1614_v59  ;;  %1705 = vmatpush.msra.mxu1 %v1627_v29  ;;  %v2829_v45 = vpop.eup %1991  ;;  %v1612_v27 = vld [vmem:[#allocation17 + $0x38] sm:$0xff]  ;;  %v1553_v29 = vmul.f32 1.442695, %v1543_v39 }
 0x92e   :  { %v1496_v24 = vmul.f32 %v1488_v43, %v2736_v2  ;;  %1724 = vmatpush.msra.mxu3 %v1647_v22  ;;  %v1463_v62 = vmul.f32 1.0614054, %v2818_v36  ;;  %1751 = vmatpush.msra.mxu0 %v1659_v13  ;;  %v1645_v43 = vld [vmem:[#allocation17 + $0x140] sm:$0xff]  ;;  %v2839_v37 = vpop.eup %1993  ;;  %v2849_v22 = vmul.f32 %v2829_v45, %v2780_v55  ;;  %v1624_v31 = vld [vmem:[#allocation17 + $0x98] sm:$0xff]  ;;  %vm1422_vm3 = vweird.f32 %v2829_v45 }
 0x92f   :  { %v1502_v30 = vadd.f32 -0.28449672, %v1494_v5  ;;  %v1477_v58 = vmul.f32 %v1469_v26, %v2792_v9  ;;  %1680 = vmatpush.msrb.mxu2 %v1613_v54  ;;  %1706 = vmatpush.msra.mxu1 %v1626_v38  ;;  %v1538_v26 = vsub.f32 0.0, %v2748_v12  ;;  %v2864_v34 = vmul.f32 %v2839_v37, %v2782_v8  ;;  %v1642_v38 = vld [vmem:[#allocation17 + $0x128] sm:$0xff]  ;;  %vm2895_vm5 = vmor %vm1421_vm4, %vm1422_vm3 }
 0x930   :  { %v1504_v15 = vadd.f32 -0.28449672, %v1496_v24  ;;  %1725 = vmatpush.msra.mxu3 %v1646_v41  ;;  %v1471_v5 = vadd.f32 -1.4531521, %v1463_v62  ;;  %1752 = vmatpush.msra.mxu0 %v1658_v51  ;;  %v1329_v24 = vmul.f32 0.3275911, %v2827_v47  ;;  %vm1452_vm8 = vweird.f32 %v2839_v37 }
 0x931   :  { %v1510_v16 = vmul.f32 %v1502_v30, %v2725_v42  ;;  %v1485_v3 = vadd.f32 1.4214138, %v1477_v58  ;;  %1681 = vmatpush.msrb.mxu2 %v1612_v27  ;;  %1707 = vmatpush.msra.mxu1 %v1625_v25  ;;  %v1611_v30 = vld [vmem:[#allocation17 + $0x30] sm:$0xff]  ;;  %v1610_v41 = vld [vmem:[#allocation17 + $0x28] sm:$0xff]  ;;  %v1641_v27 = vld [vmem:[#allocation17 + $0x120] sm:$0xff]  ;;  %vm1306_vm3 = vcmp.ge.f32.partialorder %v2697_v35, 0.0 }
 0x932   :  { %v1512_v57 = vmul.f32 %v1504_v15, %v2736_v2  ;;  %1726 = vmatpush.msra.mxu3 %v1645_v43  ;;  %v2857_v33 = vadd.f32 1.0, %v1329_v24  ;;  %1753 = vmatpush.msra.mxu0 %v1657_v6  ;;  %v1623_v62 = vld [vmem:[#allocation17 + $0x90] sm:$0xff]  ;;  %v1540_v24 = vsub.f32 0.0, %v2755_v19  ;;  %v1654_v25 = vld [vmem:[#allocation17 + $0x188] sm:$0xff]  ;;  %v1996_v6 = vpop.eup %1995  ;;  %vm2919_vm9 = vmor %vm1451_vm7, %vm1452_vm8  ;;  %vm1308_vm4 = vcmp.ge.f32.partialorder %v2713_v48, 0.0 }
 0x933   :  { %v1518_v56 = vadd.f32 0.2548296, %v1510_v16  ;;  %v1493_v59 = vmul.f32 %v1485_v3, %v2792_v9  ;;  %v1656_v16 = vld [vmem:[#allocation17 + $0x198] sm:$0xff]  ;;  %1682 = vmatpush.msrb.mxu2 %v1611_v30  ;;  %1708 = vmatpush.msra.mxu1 %v1624_v31  ;;  %v1609_v3 = vld [vmem:[#allocation17 + $0x20] sm:$0xff]  ;;  %v1448_v30 = vsub.f32 1.0, %v2864_v34  ;;  %v1292_v48 = vmul.f32 0.5, %v2676_v23 }
 0x934   :  { %v1520_v10 = vadd.f32 0.2548296, %v1512_v57  ;;  %1727 = vmatpush.msra.mxu3 %v1644_v28  ;;  %v1331_v57 = vmul.f32 0.3275911, %v2837_v63  ;;  %1997 = vrcp.f32 %v2857_v33  ;;  %1754 = vmatpush.msra.mxu0 %v1656_v16  ;;  %v1608_v28 = vld [vmem:[#allocation17 + $0x18] sm:$0xff]  ;;  %v1653_v31 = vld [vmem:[#allocation17 + $0x180] sm:$0xff]  ;;  %vm1406_vm11 = vweird.f32 %v2857_v33 }
 0x935   :  { %v1526_v14 = vmul.f32 %v1518_v56, %v2725_v42  ;;  %v1479_v42 = vmul.f32 %v1471_v5, %v2818_v36  ;;  %v1501_v39 = vadd.f32 -0.28449672, %v1493_v59  ;;  %1683 = vmatpush.msrb.mxu2 %v1610_v41  ;;  %1709 = vmatpush.msra.mxu1 %v1623_v62  ;;  %v1622_v5 = vld [vmem:[#allocation17 + $0x88] sm:$0xff]  ;;  %1999 = vpow2.f32 %v1553_v29  ;;  %v1640_v29 = vld [vmem:[#allocation17 + $0x118] sm:$0xff]  ;;  %v1639_v41 = vld [vmem:[#allocation17 + $0x110] sm:$0xff] }
 0x936   :  { %v1528_v11 = vmul.f32 %v1520_v10, %v2736_v2  ;;  %v1643_v2 = vld [vmem:[#allocation17 + $0x130] sm:$0xff]  ;;  %v2869_v51 = vadd.f32 1.0, %v1331_v57  ;;  %v1606_v57 = vld [vmem:[#allocation17 + $0x8] sm:$0xff] }
 0x937   :  { %v1566_v15 = vmul.f32 %v2740_v4, %v1526_v14  ;;  %v1487_v54 = vadd.f32 1.4214138, %v1479_v42  ;;  %v1418_v4 = vsub.f32 1.0, %v2849_v22  ;;  %1728 = vmatpush.msra.mxu3 %v1643_v2  ;;  %v1509_v43 = vmul.f32 %v1501_v39, %v2792_v9  ;;  %v1655_v10 = vld [vmem:[#allocation17 + $0x190] sm:$0xff]  ;;  %1684 = vmatpush.msrb.mxu2 %v1609_v3 }
 0x938   :  { %v1568_v13 = vmul.f32 %v2757_v20, %v1528_v11  ;;  %v2873_v22 = vmul.f32 %v1538_v26, %v2748_v12  ;;  %1755 = vmatpush.msra.mxu0 %v1655_v10  ;;  %2001 = vrcp.f32 %v2869_v51  ;;  %1710 = vmatpush.msra.mxu1 %v1622_v5  ;;  %vm1436_vm15 = vweird.f32 %v2869_v51 }
 0x939   :  { %v1574_v58 = vsub.f32 1.0, %v1566_v15  ;;  %v1495_v56 = vmul.f32 %v1487_v54, %v2818_v36  ;;  %1729 = vmatpush.msra.mxu3 %v1642_v38  ;;  %v1517_v59 = vadd.f32 0.2548296, %v1509_v43  ;;  %v1607_v15 = vld [vmem:[#allocation17 + $0x10] sm:$0xff]  ;;  %v1419_v26 = vmul.f32 %v2829_v45, %v1418_v4  ;;  %1685 = vmatpush.msrb.mxu2 %v1608_v28 }
 0x93a   :  { %v1576_v20 = vsub.f32 1.0, %v1568_v13  ;;  %1756 = vmatpush.msra.mxu0 %v1654_v25  ;;  %v1425_v13 = vand.u32 2147483647, %v2780_v55  ;;  %v2884_v39 = vpop.eup %1997  ;;  %v1637_v25 = vld [vmem:[#allocation17 + $0x100] sm:$0xff] }
 0x93b   :  { %v1582_v14 = vmul.f32 %v1574_v58, %v2631_v53  ;;  %v1503_v42 = vadd.f32 -0.28449672, %v1495_v56  ;;  %v1621_v53 = vld [vmem:[#allocation17 + $0x80] sm:$0xff]  ;;  %1730 = vmatpush.msra.mxu3 %v1641_v27  ;;  %v1525_v2 = vmul.f32 %v1517_v59, %v2792_v9  ;;  %v1420_v58 = vadd.f32 %v2829_v45, %v1419_v26  ;;  %1686 = vmatpush.msrb.mxu2 %v1607_v15  ;;  %v2000_v43 = vpop.eup %1999 }
 0x93c   :  { %v1584_v11 = vmul.f32 %v1576_v20, %v2634_v1  ;;  %1711 = vmatpush.msra.mxu1 %v1621_v53  ;;  %1757 = vmatpush.msra.mxu0 %v1653_v31  ;;  %v1427_v9 = vand.u32 2147483648, %v2780_v55  ;;  %v1402_v38 = vmul.f32 %v2884_v39, %v2857_v33  ;;  %v1638_v20 = vld [vmem:[#allocation17 + $0x108] sm:$0xff]  ;;  %v2900_v56 = vmul.f32 %v1540_v24, %v2755_v19 }
 0x93d   :  { %v1590_v12 = vadd.f32 1.0, %v1582_v14  ;;  %v1511_v16 = vmul.f32 %v1503_v42, %v2818_v36  ;;  %1731 = vmatpush.msra.mxu3 %v1640_v29  ;;  %v1565_v34 = vmul.f32 %v1996_v6, %v1525_v2  ;;  %v1424_v55 = vsel %vm2895_vm5, %v2829_v45, %v1420_v58  ;;  %1687 = vmatpush.msrb.mxu2 %v1606_v57 }
 0x93e   :  { %v1592_v1 = vadd.f32 1.0, %v1584_v11  ;;  %vm1426_vm6 = vcmp.eq.f32.partialorder %v1425_v13, 8.507059e+37  ;;  %v1428_v10 = vor.u32 1.1754944e-38, %v1427_v9  ;;  %v2905_v3 = vpop.eup %2001  ;;  %v1403_v27 = vsub.f32 1.0, %v1402_v38 }
 0x93f   :  { %v1598_v54 = vmul.f32 %v1590_v12, %v2626_v7  ;;  %v1519_v62 = vadd.f32 0.2548296, %v1511_v16  ;;  %1732 = vmatpush.msra.mxu3 %v1639_v41  ;;  %v1573_v5 = vsub.f32 1.0, %v1565_v34  ;;  %v1449_v19 = vmul.f32 %v2839_v37, %v1448_v30 }
 0x940   :  { %v1600_v4 = vmul.f32 %v1592_v1, %v2628_v0  ;;  %v1605_v0 = vld [vmem:[#allocation17] sm:$0xff]  ;;  %v1432_v24 = vmul.f32 %v2905_v3, %v2869_v51  ;;  %v2911_v28 = vsel %vm1426_vm6, %v1428_v10, %v1424_v55  ;;  %v1559_v42 = vmul.f32 1.442695, %v2873_v22 }
 0x941   :  { %1712 = vmatmul.f32.vlgmr.msra.gmra.mxu1 %v1598_v54  ;;  %v1527_v14 = vmul.f32 %v1519_v62, %v2818_v36  ;;  %1733 = vmatpush.msra.mxu3 %v1638_v20  ;;  %v1581_v45 = vmul.f32 %v1573_v5, %v2834_v44  ;;  %v1466_v36 = vmul.f32 1.0614054, %v2911_v28  ;;  %v1450_v59 = vadd.f32 %v2839_v37, %v1449_v19 }
 0x942   :  { %1758 = vmatmul.f32.vlgmr.msra.gmra.mxu0 %v1600_v4  ;;  %1688 = vmatpush.msrb.mxu2 %v1605_v0  ;;  %v1433_v53 = vsub.f32 1.0, %v1432_v24  ;;  %v1455_v6 = vand.u32 2147483647, %v2782_v8  ;;  %v1457_v12 = vand.u32 2147483648, %v2782_v8  ;;  %v1404_v22 = vmul.f32 %v2884_v39, %v1403_v27 }
 0x943   :  { %v1567_v11 = vmul.f32 %v2000_v43, %v1527_v14  ;;  %1734 = vmatpush.msra.mxu3 %v1637_v25  ;;  %v1589_v30 = vadd.f32 1.0, %v1581_v45  ;;  %v1474_v31 = vadd.f32 -1.4531521, %v1466_v36  ;;  %v1454_v15 = vsel %vm2919_vm9, %v2839_v37, %v1450_v59 }
 0x944   :  { %vm1456_vm10 = vcmp.eq.f32.partialorder %v1455_v6, 8.507059e+37  ;;  %v1458_v26 = vor.u32 1.1754944e-38, %v1457_v12  ;;  %vm1407_vm12 = vweird.f32 %v2884_v39  ;;  %v1405_v41 = vadd.f32 %v2884_v39, %v1404_v22 }
 0x945   :  { %v1575_v44 = vsub.f32 1.0, %v1567_v11  ;;  %v1597_v1 = vmul.f32 %v1589_v30, %v2643_v60  ;;  %v1482_v16 = vmul.f32 %v1474_v31, %v2911_v28  ;;  %v1410_v37 = vand.u32 2147483647, %v2857_v33  ;;  %vm1408_vm13 = vmor %vm1406_vm11, %vm1407_vm12 }
 0x946   :  { %v2934_v8 = vsel %vm1456_vm10, %v1458_v26, %v1454_v15  ;;  %v1412_v13 = vand.u32 2147483648, %v2857_v33  ;;  %v1537_v57 = vsub.f32 0.0, %v2827_v47  ;;  %v1434_v4 = vmul.f32 %v2905_v3, %v1433_v53 }
 0x947   :  { %v1583_v2 = vmul.f32 %v1575_v44, %v2845_v46  ;;  %1689 = vmatmul.f32.vlgmr.msrb.gmra.mxu2 %v1597_v1  ;;  %v1490_v58 = vadd.f32 1.4214138, %v1482_v16  ;;  %v1468_v60 = vmul.f32 1.0614054, %v2934_v8  ;;  %v1409_v46 = vsel %vm1408_vm13, %v2884_v39, %v1405_v41 }
 0x948   :  { %vm1411_vm14 = vcmp.eq.f32.partialorder %v1410_v37, 8.507059e+37  ;;  %v1413_v9 = vor.u32 1.1754944e-38, %v1412_v13  ;;  %v1435_v20 = vadd.f32 %v2905_v3, %v1434_v4  ;;  %vm1437_vm0 = vweird.f32 %v2905_v3 }
 0x949   :  { %v1591_v54 = vadd.f32 1.0, %v1583_v2  ;;  %v1498_v62 = vmul.f32 %v1490_v58, %v2911_v28  ;;  %v1476_v38 = vadd.f32 -1.4531521, %v1468_v60  ;;  %v1440_v7 = vand.u32 2147483647, %v2869_v51  ;;  %vm2950_vm1 = vmor %vm1436_vm15, %vm1437_vm0 }
 0x94a   :  { %v1414_v33 = vsel %vm1411_vm14, %v1413_v9, %v1409_v46  ;;  %2003 = vpow2.f32 %v1559_v42  ;;  %v1439_v10 = vsel %vm2950_vm1, %v2905_v3, %v1435_v20  ;;  %v1563_v19 = vmul.f32 1.442695, %v2900_v56 }
 0x94b   :  { %v1599_v34 = vmul.f32 %v1591_v54, %v2645_v61  ;;  %v1506_v39 = vadd.f32 -0.28449672, %v1498_v62  ;;  %v1484_v43 = vmul.f32 %v1476_v38, %v2934_v8  ;;  %v1465_v0 = vmul.f32 1.0614054, %v1414_v33 }
 0x94c   :  { %v1442_v61 = vand.u32 2147483648, %v2869_v51  ;;  %v1545_v24 = vmul.f32 %v1537_v57, %v2827_v47  ;;  %v1539_v45 = vsub.f32 0.0, %v2837_v63  ;;  %vm1441_vm2 = vcmp.eq.f32.partialorder %v1440_v7, 8.507059e+37 }
 0x94d   :  { %1735 = vmatmul.f32.vlgmr.msra.gmra.mxu3 %v1599_v34  ;;  %v1514_v5 = vmul.f32 %v1506_v39, %v2911_v28  ;;  %v1492_v14 = vadd.f32 1.4214138, %v1484_v43  ;;  %v1473_v27 = vadd.f32 -1.4531521, %v1465_v0  ;;  %2005 = vpow2.f32 %v1563_v19 }
 0x94e   :  { %v1443_v25 = vor.u32 1.1754944e-38, %v1442_v61  ;;  %v1557_v56 = vmul.f32 1.442695, %v1545_v24  ;;  %v1547_v47 = vmul.f32 %v1539_v45, %v2837_v63  ;;  %v1290_v63 = vmul.f32 0.5, %v2666_v18 }
 0x94f   :  { %v1522_v11 = vadd.f32 0.2548296, %v1514_v5  ;;  %v1500_v51 = vmul.f32 %v1492_v14, %v2934_v8  ;;  %v1481_v36 = vmul.f32 %v1473_v27, %v1414_v33  ;;  %v1316_v38 = vsel %vm1308_vm4, 1.0, %v2316_v21 }
 0x950   :  { %v1444_v59 = vsel %vm1441_vm2, %v1443_v25, %v1439_v10  ;;  %v2004_v6 = vpop.eup %2003  ;;  %2007 = vpow2.f32 %v1557_v56  ;;  %v1561_v16 = vmul.f32 1.442695, %v1547_v47  ;;  %vm1305_vm5 = vcmp.ge.f32.partialorder %v2809_v32, 0.0 }
 0x951   :  { %v1467_v42 = vmul.f32 1.0614054, %v1444_v59  ;;  %v1530_v3 = vmul.f32 %v1522_v11, %v2911_v28  ;;  %v1508_v53 = vadd.f32 -0.28449672, %v1500_v51  ;;  %v1489_v29 = vadd.f32 1.4214138, %v1481_v36 }
 0x952   :  { %v1314_v28 = vsel %vm1306_vm3, 1.0, %v2316_v21  ;;  %2009 = vpow2.f32 %v1561_v16  ;;  %v1313_v0 = vsel %vm1305_vm5, 1.0, %v2316_v21  ;;  %vm1307_vm6 = vcmp.ge.f32.partialorder %v2813_v17, 0.0  ;;  %v1936_v17 = vld [vmem:[%s3004_s12] ss:$0 sm:$0xff]  ;;  %s2317_s12 = smov [#allocation19]  }
 0x953   :  { %v1475_v12 = vadd.f32 -1.4531521, %v1467_v42  ;;  %v1570_v30 = vmul.f32 %v2004_v6, %v1530_v3  ;;  %v1516_v44 = vmul.f32 %v1508_v53, %v2934_v8  ;;  %v1497_v31 = vmul.f32 %v1489_v29, %v1414_v33  ;;  %v2006_v13 = vpop.eup %2005  ;;  %s1853_s22 = sshll.u32 %s2317_s12, 4  ;;  %s1854_s22 = int_to_ptr.vmem [resolvable:$true] %s1853_s22 }
 0x954   :  { %v1289_v14 = vmul.f32 0.5, %v2717_v50  ;;  %v1315_v19 = vsel %vm1307_vm6, 1.0, %v2316_v21  ;;  %v1291_v24 = vmul.f32 0.5, %v2721_v52 }
 0x955   :  { %v1483_v15 = vmul.f32 %v1475_v12, %v1444_v59  ;;  %v1578_v26 = vsub.f32 1.0, %v1570_v30  ;;  %v1524_v22 = vadd.f32 0.2548296, %v1516_v44  ;;  %v1505_v1 = vadd.f32 -0.28449672, %v1497_v31 }
 0x956   :  { %v2008_v62 = vpop.eup %2007 }
 0x957   :  { %v1491_v2 = vadd.f32 1.4214138, %v1483_v15  ;;  %v1586_v41 = vmul.f32 %v1578_v26, %v1314_v28  ;;  %v1532_v35 = vmul.f32 %v1524_v22, %v2934_v8  ;;  %v1513_v37 = vmul.f32 %v1505_v1, %v1414_v33 }
 0x958   :  { %v2010_v61 = vpop.eup %2009 }
 0x959   :  { %v1499_v54 = vmul.f32 %v1491_v2, %v1444_v59  ;;  %v1594_v57 = vadd.f32 1.0, %v1586_v41  ;;  %v1572_v58 = vmul.f32 %v2006_v13, %v1532_v35  ;;  %v1521_v60 = vadd.f32 0.2548296, %v1513_v37 }
 0x95b   :  { %v1507_v46 = vadd.f32 -0.28449672, %v1499_v54  ;;  %v1602_v9 = vmul.f32 %v1594_v57, %v1290_v63  ;;  %v1580_v4 = vsub.f32 1.0, %v1572_v58  ;;  %v1529_v34 = vmul.f32 %v1521_v60, %v1414_v33 }
 0x95d   :  { %v1515_v20 = vmul.f32 %v1507_v46, %v1444_v59  ;;  %1715 = vmatmul.f32.gmra.mxu1 %v1602_v9  ;;  %v1588_v8 = vmul.f32 %v1580_v4, %v1316_v38  ;;  %v1569_v18 = vmul.f32 %v2008_v62, %v1529_v34 }
 0x95f   :  { %v1523_v7 = vadd.f32 0.2548296, %v1515_v20  ;;  %v1596_v39 = vadd.f32 1.0, %v1588_v8  ;;  %v1577_v43 = vsub.f32 1.0, %v1569_v18 }
 0x961   :  { %v1531_v55 = vmul.f32 %v1523_v7, %v1444_v59  ;;  %v1604_v10 = vmul.f32 %v1596_v39, %v1292_v48  ;;  %v1585_v33 = vmul.f32 %v1577_v43, %v1313_v0 }
 0x963   :  { %v1571_v5 = vmul.f32 %v2010_v61, %v1531_v55  ;;  %1761 = vmatmul.f32.gmra.mxu0 %v1604_v10  ;;  %v1593_v32 = vadd.f32 1.0, %v1585_v33 }
 0x965   :  { %v1579_v27 = vsub.f32 1.0, %v1571_v5  ;;  %v1601_v25 = vmul.f32 %v1593_v32, %v1289_v14 }
 0x967   :  { %v1587_v23 = vmul.f32 %v1579_v27, %v1315_v19  ;;  %1692 = vmatmul.f32.gmra.mxu2 %v1601_v25 }
 0x969   :  { %v1595_v45 = vadd.f32 1.0, %v1587_v23 }
 0x96b   :  { %v1603_v11 = vmul.f32 %v1595_v45, %v1291_v24 }
 0x96d   :  { %1738 = vmatmul.f32.gmra.mxu3 %v1603_v11 }
 0x9be   :  { %v1713_v50 = vpop.f32.mrf.mxu1 }
 0x9bf   :  { %v1759_v53 = vpop.f32.mrf.mxu0 }
 0x9ca   :  { %v1690_v51 = vpop.f32.mrf.mxu2 }
 0x9cb   :  { %v1691_v36 = vadd.f32 %v1936_v17, %v1690_v51 }
 0x9cd   :  { %v1714_v59 = vadd.f32 %v1713_v50, %v1691_v36 }
 0x9d0   :  { %v1736_v42 = vpop.f32.mrf.mxu3 }
 0x9d1   :  { %v1737_v3 = vadd.f32 %v1736_v42, %v1714_v59 }
 0x9d3   :  { %v1760_v29 = vadd.f32 %v1759_v53, %v1737_v3 }
 0x9d5   :  { %v1767_v6 = vmul.f32 0.70710677, %v1760_v29  ;;  %v1765_v27 = vmul.f32 0.5, %v1760_v29 }
 0x9d7   :  { %v1773_v56 = vand.u32 2147483647, %v1767_v6  ;;  %vm1769_vm11 = vcmp.ge.f32.partialorder %v1767_v6, 0.0 }
 0x9d8   :  { %v1771_v33 = vsel %vm1769_vm11, 1.0, %v2316_v21 }
 0x9d9   :  { %v1775_v12 = vmul.f32 0.3275911, %v1773_v56  ;;  %v1827_v41 = vsub.f32 0.0, %v1773_v56 }
 0x9da   :  { %v1716_v37 = vpop.f32.mrf.mxu1 }
 0x9db   :  { %v1777_v47 = vadd.f32 1.0, %v1775_v12  ;;  %v1829_v57 = vmul.f32 %v1827_v41, %v1773_v56 }
 0x9dd   :  { %2011 = vrcp.f32 %v1777_v47  ;;  %v1790_v31 = vand.u32 2147483648, %v1777_v47  ;;  %v1788_v26 = vand.u32 2147483647, %v1777_v47  ;;  %vm1784_vm8 = vweird.f32 %v1777_v47 }
 0x9de   :  { %v1831_v62 = vmul.f32 1.442695, %v1829_v57 }
 0x9df   :  { %v1791_v1 = vor.u32 1.1754944e-38, %v1790_v31  ;;  %vm1789_vm10 = vcmp.eq.f32.partialorder %v1788_v26, 8.507059e+37 }
 0x9e0   :  { %v1762_v9 = vpop.f32.mrf.mxu0  ;;  %2013 = vpow2.f32 %v1831_v62 }
 0x9e3   :  { %v2012_v52 = vpop.eup %2011 }
 0x9e4   :  { %v1780_v30 = vmul.f32 %v2012_v52, %v1777_v47  ;;  %vm1785_vm7 = vweird.f32 %v2012_v52 }
 0x9e5   :  { %vm1786_vm9 = vmor %vm1784_vm8, %vm1785_vm7 }
 0x9e6   :  { %v1781_v44 = vsub.f32 1.0, %v1780_v30  ;;  %v2014_v55 = vpop.eup %2013 }
 0x9e8   :  { %v1782_v15 = vmul.f32 %v2012_v52, %v1781_v44 }
 0x9ea   :  { %v1783_v22 = vadd.f32 %v2012_v52, %v1782_v15  ;;  %v1693_v2 = vpop.f32.mrf.mxu2 }
 0x9eb   :  { %v1694_v35 = vadd.f32 %v1936_v17, %v1693_v2 }
 0x9ec   :  { %v1787_v28 = vsel %vm1786_vm9, %v2012_v52, %v1783_v22 }
 0x9ed   :  { %v1792_v16 = vsel %vm1789_vm10, %v1791_v1, %v1787_v28  ;;  %v1717_v63 = vadd.f32 %v1716_v37, %v1694_v35 }
 0x9ee   :  { %v1809_v13 = vmul.f32 1.0614054, %v1792_v16 }
 0x9f0   :  { %v1811_v54 = vadd.f32 -1.4531521, %v1809_v13  ;;  %v1739_v58 = vpop.f32.mrf.mxu3 }
 0x9f1   :  { %v1740_v46 = vadd.f32 %v1739_v58, %v1717_v63 }
 0x9f2   :  { %v1813_v60 = vmul.f32 %v1811_v54, %v1792_v16 }
 0x9f3   :  { %v1763_v34 = vadd.f32 %v1762_v9, %v1740_v46 }
 0x9f4   :  { %v1815_v4 = vadd.f32 1.4214138, %v1813_v60 }
 0x9f5   :  { %v1768_v20 = vmul.f32 0.70710677, %v1763_v34  ;;  %v1766_v28 = vmul.f32 0.5, %v1763_v34 }
 0x9f6   :  { %v1817_v38 = vmul.f32 %v1815_v4, %v1792_v16 }
 0x9f7   :  { %v1774_v18 = vand.u32 2147483647, %v1768_v20  ;;  %vm1770_vm0 = vcmp.ge.f32.partialorder %v1768_v20, 0.0 }
 0x9f8   :  { %v1819_v8 = vadd.f32 -0.28449672, %v1817_v38  ;;  %v1772_v22 = vsel %vm1770_vm0, 1.0, %v2316_v21 }
 0x9f9   :  { %v1776_v48 = vmul.f32 0.3275911, %v1774_v18  ;;  %v1828_v42 = vsub.f32 0.0, %v1774_v18 }
 0x9fa   :  { %v1821_v7 = vmul.f32 %v1819_v8, %v1792_v16 }
 0x9fb   :  { %v1778_v43 = vadd.f32 1.0, %v1776_v48  ;;  %v1830_v29 = vmul.f32 %v1828_v42, %v1774_v18 }
 0x9fc   :  { %v1823_v39 = vadd.f32 0.2548296, %v1821_v7 }
 0x9fd   :  { %2015 = vrcp.f32 %v1778_v43  ;;  %v1805_v24 = vand.u32 2147483648, %v1778_v43  ;;  %v1803_v11 = vand.u32 2147483647, %v1778_v43  ;;  %vm1799_vm13 = vweird.f32 %v1778_v43 }
 0x9fe   :  { %v1825_v0 = vmul.f32 %v1823_v39, %v1792_v16  ;;  %v1833_v12 = vmul.f32 1.442695, %v1830_v29 }
 0x9ff   :  { %v1806_v36 = vor.u32 1.1754944e-38, %v1805_v24  ;;  %vm1804_vm15 = vcmp.eq.f32.partialorder %v1803_v11, 8.507059e+37 }
 0xa00   :  { %v1835_v61 = vmul.f32 %v2014_v55, %v1825_v0  ;;  %2017 = vpow2.f32 %v1833_v12 }
 0xa02   :  { %v1837_v10 = vsub.f32 1.0, %v1835_v61 }
 0xa03   :  { %v2016_v5 = vpop.eup %2015 }
 0xa04   :  { %v1839_v14 = vmul.f32 %v1837_v10, %v1771_v33  ;;  %v1795_v32 = vmul.f32 %v2016_v5, %v1778_v43  ;;  %vm1800_vm12 = vweird.f32 %v2016_v5 }
 0xa05   :  { %vm1801_vm14 = vmor %vm1799_vm13, %vm1800_vm12 }
 0xa06   :  { %v1841_v25 = vadd.f32 1.0, %v1839_v14  ;;  %v1796_v19 = vsub.f32 1.0, %v1795_v32  ;;  %v2018_v31 = vpop.eup %2017 }
 0xa08   :  { %v1843_v23 = vmul.f32 %v1841_v25, %v1765_v27  ;;  %v1797_v45 = vmul.f32 %v2016_v5, %v1796_v19 }
 0xa0a   :  { %v1845_v17 = vadd.f32 %v1843_v23, %v2573_v40  ;;  %v1798_v51 = vadd.f32 %v2016_v5, %v1797_v45 }
 0xa0c   :  { %1847 = vst [vmem:[#allocation19] sm:$0xff] %v1845_v17  ;;  %v1802_v50 = vsel %vm1801_vm14, %v2016_v5, %v1798_v51 }
 0xa0d   :  { %v1807_v59 = vsel %vm1804_vm15, %v1806_v36, %v1802_v50 }
 0xa0e   :  { %v1810_v3 = vmul.f32 1.0614054, %v1807_v59 }
 0xa10   :  { %v1812_v53 = vadd.f32 -1.4531521, %v1810_v3 }
 0xa12   :  { %v1814_v6 = vmul.f32 %v1812_v53, %v1807_v59 }
 0xa14   :  { %v1816_v56 = vadd.f32 1.4214138, %v1814_v6 }
 0xa16   :  { %v1818_v47 = vmul.f32 %v1816_v56, %v1807_v59 }
 0xa18   :  { %v1820_v52 = vadd.f32 -0.28449672, %v1818_v47 }
 0xa1a   :  { %v1822_v30 = vmul.f32 %v1820_v52, %v1807_v59 }
 0xa1c   :  { %v1824_v40 = vadd.f32 0.2548296, %v1822_v30 }
 0xa1e   :  { %v1826_v44 = vmul.f32 %v1824_v40, %v1807_v59 }
 0xa20   :  { %v1836_v15 = vmul.f32 %v2018_v31, %v1826_v44 }
 0xa22   :  { %v1838_v26 = vsub.f32 1.0, %v1836_v15 }
 0xa24   :  { %v1840_v1 = vmul.f32 %v1838_v26, %v1772_v22 }
 0xa26   :  { %v1842_v2 = vadd.f32 1.0, %v1840_v1 }
 0xa28   :  { %v1844_v16 = vmul.f32 %v1842_v2, %v1766_v28 }
 0xa2a   :  { %v1846_v41 = vadd.f32 %v1844_v16, %v2577_v49 }
 0xa2c   :  { %1848 = vst [vmem:[#allocation19 + $0x8] sm:$0xff] %v1846_v41 }
 0xa2d   :  { %1861 = dma.vmem_to_hbm [thread:$0]  %s1854_s22, 256, %s1856_s24, [#allocation4], %s2304_s18, %s2304_s18, %s2305_s8  }
 0xa2e   :  { %2295 = dma.done.wait [#allocation4], 256  }
 0xa2f   :  { %2296 = vsyncadd [#allocation4], 4294967040 }
 0xa30   :  { %1866 = vsyncpa [#allocation3], 1 }
 0xa31   :  { %1867 = vsyncpa [#allocation6], 1 }
 0xa32   :  { %1868 = vsyncpa [#allocation9], 1 }
 0xa33   :  { %1869 = vsyncpa [#allocation12], 1 }
 0xa34   :  { %1870 = vsyncpa [#allocation15], 1 }
 0xa35   :  { %1871 = vsyncpa [#allocation18], 1 }
 0xa36   :  { %1872 = vsyncpa [#allocation4], 1 }

</bundles_post_ra>
